<compile_context>
chip_gen: v7x
topology: tpu7x:2x2x1
jax: 0.10.0
libtpu: 0.0.40
codegen_flags: <defaults>
</compile_context>

<pallas_src>
import jax
import jax.numpy as jnp
from jax.experimental import pallas as pl
from jax.experimental.pallas import tpu as pltpu

HIDDEN = 1024
IN_FEATURES = 784
NUM_CLASSES = 10
PADDED_CLASSES = 128  # lane-dense class dimension
NEG_BIG = -1e30       # finite "-inf" baked into padded bias columns


def _mlp_kernel(x_ref, w1_ref, b1_ref, w2_ref, b2_ref, o_ref):
    # x_ref : (TB, 784)    f32  (cast to bf16 in-kernel; hides the convert under MXU)
    # w1_ref: (784, 1024)  bf16
    # b1_ref: (1, 1024)    f32
    # w2_ref: (1024, 128)  bf16 (classes zero-padded 10 -> 128)
    # b2_ref: (1, 128)     f32  (padded class columns = -1e30)
    # o_ref : (TB, 128)    f32  (lane-dense output slab)
    x = x_ref[...].astype(jnp.bfloat16)
    h = jnp.dot(x, w1_ref[...], preferred_element_type=jnp.float32)
    h = jnp.maximum(h + b1_ref[...], 0.0)                       # bias + ReLU on VPU

    logits = jnp.dot(h.astype(jnp.bfloat16), w2_ref[...],
                     preferred_element_type=jnp.float32) + b2_ref[...]
    # padded class columns already carry -1e30 via b2 -> no iota/where mask needed

    # numerically-stable softmax along the class axis
    m = jnp.max(logits, axis=-1, keepdims=True)
    e = jnp.exp(logits - m)
    denom = jnp.sum(e, axis=-1, keepdims=True)
    o_ref[...] = (e * pl.reciprocal(denom, approx=True)).astype(o_ref.dtype)


def _round_up(x, m):
    return (x + m - 1) // m * m


def prepare_params(w1, b1, w2, b2):
    """One-time parameter prep (outside the forward path).
    PyTorch layout in: w1 (1024,784), b1 (1024,), w2 (10,1024), b2 (10,).
    Returns kernel-ready (in, out)-major, bf16, class-padded tensors."""
    w1t = jnp.asarray(w1).T.astype(jnp.bfloat16)                       # (784, 1024)
    b1r = jnp.asarray(b1, jnp.float32).reshape(1, HIDDEN)              # (1, 1024)
    w2t = jnp.asarray(w2).T.astype(jnp.bfloat16)                       # (1024, 10)
    w2t_pad = jnp.zeros((HIDDEN, PADDED_CLASSES), jnp.bfloat16).at[:, :NUM_CLASSES].set(w2t)
    # padded columns get a large negative bias so they contribute 0 to the softmax
    b2r_pad = jnp.full((1, PADDED_CLASSES), NEG_BIG, jnp.float32).at[0, :NUM_CLASSES].set(
        jnp.asarray(b2, jnp.float32))
    return w1t, b1r, w2t_pad, b2r_pad


def mnist_linear_forward(x_nchw, params, tile_b=1024):
    """x_nchw: (B, 1, 28, 28) float32. params: output of prepare_params()."""
    w1t, b1r, w2t_pad, b2r_pad = params
    B = x_nchw.shape[0]
    x2d = x_nchw.reshape(B, IN_FEATURES)          # f32; cast to bf16 inside the kernel

    B16 = _round_up(B, 16)                        # bf16 packs 16 rows/sublane-vreg
    TB = min(tile_b, B16)
    if TB == B16 and B16 >= 32:
        # split into >= 2 tiles so both v7x TensorCores get work (no-op on v5e/v6e)
        TB = _round_up(B16 // 2, 16)
    B_pad = _round_up(B16, TB)
    if B_pad != B:
        x2d = jnp.pad(x2d, ((0, B_pad - B), (0, 0)))
    grid = (B_pad // TB,)

    cp_kwargs = dict(dimension_semantics=("parallel",))       # megacore on v7x
    if TB >= 1024:
        cp_kwargs["vmem_limit_bytes"] = 48 << 20               # v5e default is 16 MiB

    out = pl.pallas_call(
        _mlp_kernel,
        out_shape=jax.ShapeDtypeStruct((B_pad, PADDED_CLASSES), jnp.float32),
        grid=grid,
        in_specs=[
            pl.BlockSpec((TB, IN_FEATURES), lambda i: (i, 0)),          # x tile, pipelined
            pl.BlockSpec((IN_FEATURES, HIDDEN), lambda i: (0, 0)),      # w1 resident
            pl.BlockSpec((1, HIDDEN), lambda i: (0, 0)),                # b1 resident
            pl.BlockSpec((HIDDEN, PADDED_CLASSES), lambda i: (0, 0)),   # w2 resident
            pl.BlockSpec((1, PADDED_CLASSES), lambda i: (0, 0)),        # b2 resident
        ],
        out_specs=pl.BlockSpec((TB, PADDED_CLASSES), lambda i: (i, 0)),
        compiler_params=pltpu.CompilerParams(**cp_kwargs),
    )(x2d, w1t, b1r, w2t_pad, b2r_pad)

    return out[:B, :NUM_CLASSES]


if __name__ == "__main__":
    key = jax.random.PRNGKey(0)
    kx, k1, k2, k3, k4 = jax.random.split(key, 5)

    B = 8
    x = jax.random.normal(kx, (B, 1, 28, 28), dtype=jnp.float32)

    # Deterministic parameter init (PyTorch-style uniform +/- 1/sqrt(fan_in))
    s1 = 1.0 / jnp.sqrt(784.0)
    s2 = 1.0 / jnp.sqrt(1024.0)
    w1 = jax.random.uniform(k1, (1024, 784), jnp.float32, -s1, s1)
    b1 = jax.random.uniform(k2, (1024,), jnp.float32, -s1, s1)
    w2 = jax.random.uniform(k3, (10, 1024), jnp.float32, -s2, s2)
    b2 = jax.random.uniform(k4, (10,), jnp.float32, -s2, s2)

    params = prepare_params(w1, b1, w2, b2)   # one-time prep (no per-call transpose)
    out = mnist_linear_forward(x, params)
    out = jax.block_until_ready(out)

    # Reference that mirrors the kernel's bf16 quantization (f32 accumulation)
    x2d = x.reshape(B, 784)
    h_ref = jnp.dot(x2d.astype(jnp.bfloat16), w1.T.astype(jnp.bfloat16),
                    preferred_element_type=jnp.float32) + b1
    h_ref = jnp.maximum(h_ref, 0.0)
    logits_ref = jnp.dot(h_ref.astype(jnp.bfloat16), w2.T.astype(jnp.bfloat16),
                         preferred_element_type=jnp.float32) + b2
    ref = jax.nn.softmax(logits_ref, axis=1)

    assert out.shape == (B, 10)
    assert jnp.allclose(out, ref, atol=2e-3, rtol=2e-3), (
        f"max abs diff {jnp.max(jnp.abs(out - ref))}")

    print("KERNEL_OK")
</pallas_src>

<mosaic_0001>
module attributes {stable_mosaic.version = 11 : i64} {
  func.func @_mlp_kernel(%arg0: i32, %arg1: memref<16x784xf32, #tpu.memory_space<vmem>>, %arg2: memref<784x1024xbf16, #tpu.memory_space<vmem>>, %arg3: memref<1x1024xf32, #tpu.memory_space<vmem>>, %arg4: memref<1024x128xbf16, #tpu.memory_space<vmem>>, %arg5: memref<1x128xf32, #tpu.memory_space<vmem>>, %arg6: memref<16x128xf32, #tpu.memory_space<vmem>>) attributes {dimension_semantics = [#tpu.dimension_semantics<parallel>], iteration_bounds = array<i64: 1>, scalar_prefetch = 0 : i64, scratch_operands = 0 : i64, tpu.core_type = #tpu.core_type<tc>, window_params = [{transform_indices = @transform_0, window_bounds = array<i64: 16, 784>}, {pipeline_mode = #tpu.pipeline_mode<synchronous>, transform_indices = @transform_1, window_bounds = array<i64: 784, 1024>}, {pipeline_mode = #tpu.pipeline_mode<synchronous>, transform_indices = @transform_2, window_bounds = array<i64: 1, 1024>}, {pipeline_mode = #tpu.pipeline_mode<synchronous>, transform_indices = @transform_3, window_bounds = array<i64: 1024, 128>}, {pipeline_mode = #tpu.pipeline_mode<synchronous>, transform_indices = @transform_4, window_bounds = array<i64: 1, 128>}, {transform_indices = @transform_5, window_bounds = array<i64: 16, 128>}]} {
    %c0 = arith.constant 0 : index
    %c0_0 = arith.constant 0 : index
    %0 = vector.load %arg1[%c0, %c0_0] : memref<16x784xf32, #tpu.memory_space<vmem>>, vector<16x784xf32>
    %1 = arith.truncf %0 : vector<16x784xf32> to vector<16x784xbf16>
    %c0_1 = arith.constant 0 : index
    %c0_2 = arith.constant 0 : index
    %2 = vector.load %arg2[%c0_1, %c0_2] : memref<784x1024xbf16, #tpu.memory_space<vmem>>, vector<784x1024xbf16>
    %cst = arith.constant dense<0.000000e+00> : vector<16x1024xf32>
    %3 = tpu.matmul %1, %2, %cst {dimension_numbers = #tpu.dot_dimension_numbers<[1], [0], [0], [1], [0, 0, 1, 1], [], []>} : vector<16x784xbf16>, vector<784x1024xbf16>, vector<16x1024xf32> -> vector<16x1024xf32>
    %c0_3 = arith.constant 0 : index
    %c0_4 = arith.constant 0 : index
    %4 = vector.load %arg3[%c0_3, %c0_4] : memref<1x1024xf32, #tpu.memory_space<vmem>>, vector<1x1024xf32>
    %5 = vector.broadcast %4 : vector<1x1024xf32> to vector<16x1024xf32>
    %6 = arith.addf %3, %5 : vector<16x1024xf32>
    %cst_5 = arith.constant 0.000000e+00 : f32
    %7 = vector.broadcast %cst_5 : f32 to vector<16x1024xf32>
    %8 = arith.maximumf %6, %7 : vector<16x1024xf32>
    %9 = arith.truncf %8 : vector<16x1024xf32> to vector<16x1024xbf16>
    %c0_6 = arith.constant 0 : index
    %c0_7 = arith.constant 0 : index
    %10 = vector.load %arg4[%c0_6, %c0_7] : memref<1024x128xbf16, #tpu.memory_space<vmem>>, vector<1024x128xbf16>
    %cst_8 = arith.constant dense<0.000000e+00> : vector<16x128xf32>
    %11 = tpu.matmul %9, %10, %cst_8 {dimension_numbers = #tpu.dot_dimension_numbers<[1], [0], [0], [1], [0, 0, 1, 1], [], []>} : vector<16x1024xbf16>, vector<1024x128xbf16>, vector<16x128xf32> -> vector<16x128xf32>
    %c0_9 = arith.constant 0 : index
    %c0_10 = arith.constant 0 : index
    %12 = vector.load %arg5[%c0_9, %c0_10] : memref<1x128xf32, #tpu.memory_space<vmem>>, vector<1x128xf32>
    %13 = vector.broadcast %12 : vector<1x128xf32> to vector<16x128xf32>
    %14 = arith.addf %11, %13 : vector<16x128xf32>
    %cst_11 = arith.constant dense<0xFF800000> : vector<16xf32>
    %15 = vector.multi_reduction <maximumf>, %14, %cst_11 [1] : vector<16x128xf32> to vector<16xf32>
    %16 = vector.shape_cast %15 : vector<16xf32> to vector<16x1xf32>
    %17 = vector.broadcast %16 : vector<16x1xf32> to vector<16x128xf32>
    %18 = arith.subf %14, %17 : vector<16x128xf32>
    %19 = math.exp %18 : vector<16x128xf32>
    %cst_12 = arith.constant dense<0.000000e+00> : vector<16xf32>
    %20 = vector.multi_reduction <add>, %19, %cst_12 [1] : vector<16x128xf32> to vector<16xf32>
    %21 = vector.shape_cast %20 : vector<16xf32> to vector<16x1xf32>
    %22 = tpu.reciprocal %21 {approx = true} : vector<16x1xf32> -> vector<16x1xf32>
    %23 = vector.broadcast %22 : vector<16x1xf32> to vector<16x128xf32>
    %24 = arith.mulf %19, %23 : vector<16x128xf32>
    %c0_13 = arith.constant 0 : index
    %c0_14 = arith.constant 0 : index
    %25 = vector.load %arg6[%c0_13, %c0_14] : memref<16x128xf32, #tpu.memory_space<vmem>>, vector<16x128xf32>
    tpu.vector_store %arg6[%c0_13, %c0_14], %24 {strides = array<i32>} : memref<16x128xf32, #tpu.memory_space<vmem>>, vector<16x128xf32>,
    return
  }
  func.func @transform_0(%arg0: i32) -> (i32, i32) {
    %c0_i32 = arith.constant 0 : i32
    %c0_i32_0 = arith.constant 0 : i32
    return %arg0, %c0_i32 : i32, i32
  }
  func.func @transform_1(%arg0: i32) -> (i32, i32) {
    %c0_i32 = arith.constant 0 : i32
    %c0_i32_0 = arith.constant 0 : i32
    %c0_i32_1 = arith.constant 0 : i32
    return %c0_i32, %c0_i32_0 : i32, i32
  }
  func.func @transform_2(%arg0: i32) -> (i32, i32) {
    %c0_i32 = arith.constant 0 : i32
    %c0_i32_0 = arith.constant 0 : i32
    %c0_i32_1 = arith.constant 0 : i32
    return %c0_i32, %c0_i32_0 : i32, i32
  }
  func.func @transform_3(%arg0: i32) -> (i32, i32) {
    %c0_i32 = arith.constant 0 : i32
    %c0_i32_0 = arith.constant 0 : i32
    %c0_i32_1 = arith.constant 0 : i32
    return %c0_i32, %c0_i32_0 : i32, i32
  }
  func.func @transform_4(%arg0: i32) -> (i32, i32) {
    %c0_i32 = arith.constant 0 : i32
    %c0_i32_0 = arith.constant 0 : i32
    %c0_i32_1 = arith.constant 0 : i32
    return %c0_i32, %c0_i32_0 : i32, i32
  }
  func.func @transform_5(%arg0: i32) -> (i32, i32) {
    %c0_i32 = arith.constant 0 : i32
    %c0_i32_0 = arith.constant 0 : i32
    return %arg0, %c0_i32 : i32, i32
  }
}

</mosaic_0001>

<bundles_post_ra>
// kernel: tpu_custom_call.1
= control target key start
LH: loop header
LB: loop body
LE: loop exit
PB: predicated region body
PF: predicated region fallthrough
CT: control target
= control target key end

     0   :  { %10 = vsyncpa [#allocation3], 0  ;;  %s4966_s0 = inlined_call_operand.hbm [shape: f32[16,784], index: 0, kind: input, shape index: {}]   ;;  %s4967_s1 = inlined_call_operand.hbm [shape: bf16[784,1024], index: 1, kind: input, shape index: {}]   ;;  %s4968_s2 = inlined_call_operand.hbm [shape: f32[1,1024], index: 2, kind: input, shape index: {}]   ;;  %s4969_s3 = inlined_call_operand.hbm [shape: bf16[1024,128], index: 3, kind: input, shape index: {}]   ;;  %s4970_s4 = inlined_call_operand.hbm [shape: f32[1,128], index: 4, kind: input, shape index: {}]   ;;  %s4971_s5 = inlined_call_operand.hbm [shape: f32[16,128], index: 5, kind: output, shape index: {}]  }
   0x1   :  { %11 = vsyncpa [#allocation6], 0 }
   0x2   :  { %12 = vsyncpa [#allocation9], 0 }
   0x3   :  { %13 = vsyncpa [#allocation4], 0  ;;  %s4779_s18 = smov [#allocation5]   ;;  %s4639_s22 = scalar_lea.hbm %s4967_s1, 50176 }
   0x4   :  { %s31_s19 = sshll.u32 %s4779_s18, 4  ;;  %p4640_p0 = scmp.ne.s32.totalorder %s4967_s1, %s4639_s22  ;;  %s32_s19 = int_to_ptr.vmem [resolvable:$true] %s31_s19 }
   0x5   :  { %p4643_p1 = scmp.lt.u32.totalorder %s4639_s22, %s4967_s1 }
   0x7   :  { %p4645_p2 = pnand %p4643_p1, %p4640_p0 }
   0x9   :  { %4648 = shalt.err (!%p4645_p2)
}
   0xa   :  { %s4649_s27 = scalar_lea.vmem %s32_s19, 50176  ;;  %p4654_p4 = scmp.lt.s32.totalorder %s32_s19, %s32_s19 }
   0xb   :  { %p4650_p3 = scmp.ne.s32.totalorder %s32_s19, %s4649_s27  ;;  %p4655_p5 = scmp.lt.s32.totalorder %s4649_s27, %s4649_s27 }
   0xd   :  { %p4656_p6 = por %p4655_p5, %p4654_p4 }
   0xf   :  { %p4657_p7 = pnand %p4656_p6, %p4650_p3 }
  0x11   :  { %4660 = shalt.err (!%p4657_p7)
}
  0x12   :  { %s4780_s28 = smov 512   ;;  %s4781_s29 = smov 32  }
  0x13   :  { %37 = dma.hbm_to_vmem [thread:$0]  %s4967_s1, 50176, %s32_s19, [#allocation6], %s4780_s28, %s4780_s28, %s4781_s29  }
  0x14   :  { %s4782_s7 = smov [#allocation8]   ;;  %s4661_s11 = scalar_lea.hbm %s4969_s3, 8192 }
  0x15   :  { %s53_s8 = sshll.u32 %s4782_s7, 4  ;;  %p4662_p8 = scmp.ne.s32.totalorder %s4969_s3, %s4661_s11  ;;  %s54_s8 = int_to_ptr.vmem [resolvable:$true] %s53_s8 }
  0x16   :  { %p4665_p9 = scmp.lt.u32.totalorder %s4661_s11, %s4969_s3 }
  0x18   :  { %p4667_p10 = pnand %p4665_p9, %p4662_p8 }
  0x1a   :  { %4670 = shalt.err (!%p4667_p10)
}
  0x1b   :  { %s4671_s16 = scalar_lea.vmem %s54_s8, 8192  ;;  %p4676_p12 = scmp.lt.s32.totalorder %s54_s8, %s54_s8 }
  0x1c   :  { %p4672_p11 = scmp.ne.s32.totalorder %s54_s8, %s4671_s16  ;;  %p4677_p13 = scmp.lt.s32.totalorder %s4671_s16, %s4671_s16 }
  0x1e   :  { %p4678_p0 = por %p4677_p13, %p4676_p12 }
  0x20   :  { %p4679_p1 = pnand %p4678_p0, %p4672_p11 }
  0x22   :  { %4682 = shalt.err (!%p4679_p1)
}
  0x23   :  { %s4783_s1 = smov 64   ;;  %s4784_s17 = smov 4  }
  0x24   :  { %59 = dma.hbm_to_vmem [thread:$0]  %s4969_s3, 8192, %s54_s8, [#allocation9], %s4783_s1, %s4783_s1, %s4784_s17  }
  0x25   :  { %s4785_s20 = smov [#allocation2]   ;;  %s4683_s24 = scalar_lea.hbm %s4966_s0, 1792 }
  0x26   :  { %s19_s21 = sshll.u32 %s4785_s20, 4  ;;  %p4684_p2 = scmp.ne.s32.totalorder %s4966_s0, %s4683_s24  ;;  %s20_s21 = int_to_ptr.vmem [resolvable:$true] %s19_s21 }
  0x27   :  { %p4687_p3 = scmp.lt.u32.totalorder %s4683_s24, %s4966_s0 }
  0x29   :  { %p4689_p4 = pnand %p4687_p3, %p4684_p2 }
  0x2b   :  { %4692 = shalt.err (!%p4689_p4)
}
  0x2c   :  { %s4693_s29 = scalar_lea.vmem %s20_s21, 1792  ;;  %p4698_p6 = scmp.lt.s32.totalorder %s20_s21, %s20_s21 }
  0x2d   :  { %p4694_p5 = scmp.ne.s32.totalorder %s20_s21, %s4693_s29  ;;  %p4699_p7 = scmp.lt.s32.totalorder %s4693_s29, %s4693_s29 }
  0x2f   :  { %p4700_p8 = por %p4699_p7, %p4698_p6 }
  0x31   :  { %p4701_p9 = pnand %p4700_p8, %p4694_p5 }
  0x33   :  { %4704 = shalt.err (!%p4701_p9)
}
  0x34   :  { %s4786_s3 = smov 896   ;;  %s4787_s30 = smov 56  }
  0x35   :  { %25 = dma.hbm_to_vmem [thread:$0]  %s4966_s0, 1792, %s20_s21, [#allocation3], %s4786_s3, %s4786_s3, %s4787_s30  }
  0x36   :  { %s4788_s8 = smov [#allocation7]   ;;  %s4789_s10 = smov [#allocation10]  }
  0x37   :  { %s44_s9 = sshll.u32 %s4788_s8, 4  ;;  %s66_s11 = sshll.u32 %s4789_s10, 4  ;;  %s45_s9 = int_to_ptr.vmem [resolvable:$true] %s44_s9  ;;  %s67_s11 = int_to_ptr.vmem [resolvable:$true] %s66_s11 }
  0x38   :  { %s4705_s14 = scalar_lea.hbm %s4968_s2, 128 }
  0x39   :  { %p4706_p10 = scmp.ne.s32.totalorder %s4968_s2, %s4705_s14  ;;  %p4709_p11 = scmp.lt.u32.totalorder %s4705_s14, %s4968_s2 }
  0x3b   :  { %p4711_p12 = pnand %p4709_p11, %p4706_p10 }
  0x3d   :  { %4714 = shalt.err (!%p4711_p12)
}
  0x3e   :  { %s4715_s0 = scalar_lea.vmem %s45_s9, 128  ;;  %p4720_p0 = scmp.lt.s32.totalorder %s45_s9, %s45_s9 }
  0x3f   :  { %p4716_p13 = scmp.ne.s32.totalorder %s45_s9, %s4715_s0  ;;  %p4721_p1 = scmp.lt.s32.totalorder %s4715_s0, %s4715_s0 }
  0x41   :  { %p4722_p2 = por %p4721_p1, %p4720_p0 }
  0x43   :  { %p4723_p3 = pnand %p4722_p2, %p4716_p13 }
  0x45   :  { %4726 = shalt.err (!%p4723_p3)
}
  0x46   :  { %47 = dma.hbm_to_vmem [thread:$0]  %s4968_s2, 128, %s45_s9, [#allocation6]  }
  0x47   :  { %s4727_s22 = scalar_lea.hbm %s4970_s4, 16 }
  0x48   :  { %p4728_p4 = scmp.ne.s32.totalorder %s4970_s4, %s4727_s22  ;;  %p4731_p5 = scmp.lt.u32.totalorder %s4727_s22, %s4970_s4 }
  0x4a   :  { %p4733_p6 = pnand %p4731_p5, %p4728_p4 }
  0x4c   :  { %4736 = shalt.err (!%p4733_p6)
}
  0x4d   :  { %s4737_s27 = scalar_lea.vmem %s67_s11, 16  ;;  %s4741_s28 = scalar_lea.vmem %s67_s11, 32 }
  0x4e   :  { %p4738_p7 = scmp.ne.s32.totalorder %s67_s11, %s4737_s27  ;;  %p4742_p8 = scmp.lt.s32.totalorder %s67_s11, %s67_s11 }
  0x4f   :  { %p4743_p9 = scmp.lt.s32.totalorder %s4741_s28, %s4737_s27 }
  0x51   :  { %p4744_p10 = por %p4743_p9, %p4742_p8 }
  0x53   :  { %p4745_p11 = pnand %p4744_p10, %p4738_p7 }
  0x55   :  { %4748 = shalt.err (!%p4745_p11)
}
  0x56   :  { %69 = dma.hbm_to_vmem [thread:$0]  %s4970_s4, 16, %s67_s11, [#allocation9]  }
  0x57   :  { %4771 = dma.done.wait [#allocation3], 1792  }
  0x58   :  { %4772 = vsyncadd [#allocation3], 4294965504 }
  0x59   :  { %4773 = dma.done.wait [#allocation6], 50304  }
  0x5a   :  { %4774 = vsyncadd [#allocation6], 4294916992 }
  0x5b   :  { %4775 = dma.done.wait [#allocation9], 8208  }
  0x5c   :  { %4776 = vsyncadd [#allocation9], 4294959088  ;;  %v107_v0 = vld [vmem:[#allocation5] sm:$0xff]  ;;  %v108_v2 = vld [vmem:[#allocation5 + $0x8] sm:$0xff]  ;;  %vm2501_vm0 = vcmask 130048   ;;  %s4791_s4 = smov [#allocation11]  }
  0x5d   :  { %v111_v1 = vld [vmem:[#allocation5 + $0x20] sm:$0xff]  ;;  %v112_v4 = vld [vmem:[#allocation5 + $0x28] sm:$0xff]  ;;  %v87_v53 = vld [vmem:[#allocation2 + $0x8] sm:$0xff]  ;;  %s3925_s3 = sshll.u32 %s4791_s4, 4  ;;  %s3926_s3 = int_to_ptr.vmem [resolvable:$true] %s3925_s3 }
  0x5e   :  { %v3940_v3 = vcombine.high %v107_v0, %v111_v1  ;;  %v3939_v5 = vcombine.low %v107_v0, %v111_v1  ;;  %v115_v6 = vld [vmem:[#allocation5 + $0x40] sm:$0xff]  ;;  %v3942_v8 = vcombine.high %v108_v2, %v112_v4  ;;  %v3941_v9 = vcombine.low %v108_v2, %v112_v4  ;;  %v116_v11 = vld [vmem:[#allocation5 + $0x48] sm:$0xff]  ;;  %v94_v54 = vld [vmem:[#allocation2 + $0x40] sm:$0xff]  ;;  %s4749_s30 = scalar_lea.vmem %s3926_s3, 256  ;;  %p4754_p13 = scmp.lt.s32.totalorder %s3926_s3, %s3926_s3 }
  0x5f   :  { %v119_v7 = vld [vmem:[#allocation5 + $0x60] sm:$0xff]  ;;  %v120_v12 = vld [vmem:[#allocation5 + $0x68] sm:$0xff]  ;;  %v4884_v58 = vpack.c.bf16 %v94_v54, %v87_v53  ;;  %p4750_p12 = scmp.ne.s32.totalorder %s3926_s3, %s4749_s30  ;;  %p4755_p0 = scmp.lt.s32.totalorder %s4749_s30, %s4749_s30 }
  0x60   :  { %v3948_v10 = vcombine.high %v115_v6, %v119_v7  ;;  %v123_v13 = vld [vmem:[#allocation5 + $0x80] sm:$0xff]  ;;  %2505 = vmatprep.subr.bf16.mxu0 %v3940_v3  ;;  %v3950_v14 = vcombine.high %v116_v11, %v120_v12  ;;  %v124_v16 = vld [vmem:[#allocation5 + $0x88] sm:$0xff]  ;;  %2677 = vmatprep.subr.bf16.mxu1 %v3942_v8  ;;  %v3947_v18 = vcombine.low %v115_v6, %v119_v7 }
  0x61   :  { %v127_v15 = vld [vmem:[#allocation5 + $0xa0] sm:$0xff]  ;;  %v128_v17 = vld [vmem:[#allocation5 + $0xa8] sm:$0xff]  ;;  %2506 = vmatpush1.bf16.msra.mxu0 %v3939_v5  ;;  %2678 = vmatpush1.bf16.msra.mxu1 %v3941_v9  ;;  %v3949_v19 = vcombine.low %v116_v11, %v120_v12  ;;  %p4756_p1 = por %p4755_p0, %p4754_p13 }
  0x62   :  { %2507 = vmatprep.subr.bf16.mxu0 %v3948_v10  ;;  %v3956_v20 = vcombine.high %v123_v13, %v127_v15  ;;  %2679 = vmatprep.subr.bf16.mxu1 %v3950_v14  ;;  %v3958_v21 = vcombine.high %v124_v16, %v128_v17  ;;  %v131_v22 = vld [vmem:[#allocation5 + $0xc0] sm:$0xff]  ;;  %v132_v24 = vld [vmem:[#allocation5 + $0xc8] sm:$0xff]  ;;  %v3955_v26 = vcombine.low %v123_v13, %v127_v15 }
  0x63   :  { %v135_v23 = vld [vmem:[#allocation5 + $0xe0] sm:$0xff]  ;;  %v136_v25 = vld [vmem:[#allocation5 + $0xe8] sm:$0xff]  ;;  %v3957_v27 = vcombine.low %v124_v16, %v128_v17  ;;  %2537 = vmatprep.mubr.bf16.mxu0 %v4884_v58  ;;  %2709 = vmatprep.mubr.bf16.mxu1 %v4884_v58  ;;  %p4757_p2 = pnand %p4756_p1, %p4750_p12 }
  0x64   :  { %v3964_v28 = vcombine.high %v131_v22, %v135_v23  ;;  %v3966_v29 = vcombine.high %v132_v24, %v136_v25  ;;  %v139_v30 = vld [vmem:[#allocation5 + $0x100] sm:$0xff]  ;;  %v140_v32 = vld [vmem:[#allocation5 + $0x108] sm:$0xff]  ;;  %v3963_v34 = vcombine.low %v131_v22, %v135_v23  ;;  %v3965_v35 = vcombine.low %v132_v24, %v136_v25 }
  0x65   :  { %2508 = vmatpush1.bf16.msra.mxu0 %v3947_v18  ;;  %2680 = vmatpush1.bf16.msra.mxu1 %v3949_v19  ;;  %v143_v31 = vld [vmem:[#allocation5 + $0x120] sm:$0xff]  ;;  %v144_v33 = vld [vmem:[#allocation5 + $0x128] sm:$0xff] }
  0x66   :  { %2509 = vmatprep.subr.bf16.mxu0 %v3956_v20  ;;  %2681 = vmatprep.subr.bf16.mxu1 %v3958_v21  ;;  %v3972_v36 = vcombine.high %v139_v30, %v143_v31  ;;  %v3974_v37 = vcombine.high %v140_v32, %v144_v33  ;;  %v147_v38 = vld [vmem:[#allocation5 + $0x140] sm:$0xff]  ;;  %v148_v40 = vld [vmem:[#allocation5 + $0x148] sm:$0xff]  ;;  %v3971_v42 = vcombine.low %v139_v30, %v143_v31 }
  0x67   :  { %v151_v39 = vld [vmem:[#allocation5 + $0x160] sm:$0xff]  ;;  %v152_v41 = vld [vmem:[#allocation5 + $0x168] sm:$0xff]  ;;  %v3973_v43 = vcombine.low %v140_v32, %v144_v33 }
  0x68   :  { %v3980_v44 = vcombine.high %v147_v38, %v151_v39  ;;  %v3982_v45 = vcombine.high %v148_v40, %v152_v41  ;;  %v155_v46 = vld [vmem:[#allocation5 + $0x180] sm:$0xff]  ;;  %v156_v48 = vld [vmem:[#allocation5 + $0x188] sm:$0xff]  ;;  %v3979_v50 = vcombine.low %v147_v38, %v151_v39  ;;  %v3981_v51 = vcombine.low %v148_v40, %v152_v41 }
  0x69   :  { %2510 = vmatpush1.bf16.msra.mxu0 %v3955_v26  ;;  %2682 = vmatpush1.bf16.msra.mxu1 %v3957_v27  ;;  %v159_v47 = vld [vmem:[#allocation5 + $0x1a0] sm:$0xff]  ;;  %v160_v49 = vld [vmem:[#allocation5 + $0x1a8] sm:$0xff] }
  0x6a   :  { %2511 = vmatprep.subr.bf16.mxu0 %v3964_v28  ;;  %2683 = vmatprep.subr.bf16.mxu1 %v3966_v29  ;;  %v3988_v52 = vcombine.high %v155_v46, %v159_v47  ;;  %v3990_v55 = vcombine.high %v156_v48, %v160_v49  ;;  %v163_v56 = vld [vmem:[#allocation5 + $0x1c0] sm:$0xff]  ;;  %v164_v59 = vld [vmem:[#allocation5 + $0x1c8] sm:$0xff]  ;;  %v3987_v61 = vcombine.low %v155_v46, %v159_v47 }
  0x6b   :  { %v167_v57 = vld [vmem:[#allocation5 + $0x1e0] sm:$0xff]  ;;  %v168_v60 = vld [vmem:[#allocation5 + $0x1e8] sm:$0xff]  ;;  %v3989_v62 = vcombine.low %v156_v48, %v160_v49 }
  0x6c   :  { %v3996_v63 = vcombine.high %v163_v56, %v167_v57  ;;  %v3998_v0 = vcombine.high %v164_v59, %v168_v60  ;;  %v171_v1 = vld [vmem:[#allocation5 + $0x200] sm:$0xff]  ;;  %v172_v3 = vld [vmem:[#allocation5 + $0x208] sm:$0xff]  ;;  %v3995_v5 = vcombine.low %v163_v56, %v167_v57  ;;  %v3997_v6 = vcombine.low %v164_v59, %v168_v60 }
  0x6d   :  { %2512 = vmatpush1.bf16.msra.mxu0 %v3963_v34  ;;  %2684 = vmatpush1.bf16.msra.mxu1 %v3965_v35  ;;  %v175_v2 = vld [vmem:[#allocation5 + $0x220] sm:$0xff]  ;;  %v176_v4 = vld [vmem:[#allocation5 + $0x228] sm:$0xff] }
  0x6e   :  { %2513 = vmatprep.subr.bf16.mxu0 %v3972_v36  ;;  %2685 = vmatprep.subr.bf16.mxu1 %v3974_v37  ;;  %v4004_v7 = vcombine.high %v171_v1, %v175_v2  ;;  %v4006_v8 = vcombine.high %v172_v3, %v176_v4  ;;  %v179_v9 = vld [vmem:[#allocation5 + $0x240] sm:$0xff]  ;;  %v180_v11 = vld [vmem:[#allocation5 + $0x248] sm:$0xff]  ;;  %v4003_v13 = vcombine.low %v171_v1, %v175_v2 }
  0x6f   :  { %v183_v10 = vld [vmem:[#allocation5 + $0x260] sm:$0xff]  ;;  %v184_v12 = vld [vmem:[#allocation5 + $0x268] sm:$0xff]  ;;  %v4005_v14 = vcombine.low %v172_v3, %v176_v4 }
  0x70   :  { %v4012_v15 = vcombine.high %v179_v9, %v183_v10  ;;  %v4014_v16 = vcombine.high %v180_v11, %v184_v12  ;;  %v187_v17 = vld [vmem:[#allocation5 + $0x280] sm:$0xff]  ;;  %v188_v19 = vld [vmem:[#allocation5 + $0x288] sm:$0xff]  ;;  %v4011_v21 = vcombine.low %v179_v9, %v183_v10  ;;  %v4013_v22 = vcombine.low %v180_v11, %v184_v12 }
  0x71   :  { %2514 = vmatpush1.bf16.msra.mxu0 %v3971_v42  ;;  %2686 = vmatpush1.bf16.msra.mxu1 %v3973_v43  ;;  %v191_v18 = vld [vmem:[#allocation5 + $0x2a0] sm:$0xff]  ;;  %v192_v20 = vld [vmem:[#allocation5 + $0x2a8] sm:$0xff] }
  0x72   :  { %2515 = vmatprep.subr.bf16.mxu0 %v3980_v44  ;;  %2687 = vmatprep.subr.bf16.mxu1 %v3982_v45  ;;  %v4020_v23 = vcombine.high %v187_v17, %v191_v18  ;;  %v4022_v24 = vcombine.high %v188_v19, %v192_v20  ;;  %v195_v25 = vld [vmem:[#allocation5 + $0x2c0] sm:$0xff]  ;;  %v196_v27 = vld [vmem:[#allocation5 + $0x2c8] sm:$0xff]  ;;  %v4019_v29 = vcombine.low %v187_v17, %v191_v18 }
  0x73   :  { %v199_v26 = vld [vmem:[#allocation5 + $0x2e0] sm:$0xff]  ;;  %v200_v28 = vld [vmem:[#allocation5 + $0x2e8] sm:$0xff]  ;;  %v4021_v30 = vcombine.low %v188_v19, %v192_v20 }
  0x74   :  { %v4028_v31 = vcombine.high %v195_v25, %v199_v26  ;;  %v4030_v32 = vcombine.high %v196_v27, %v200_v28  ;;  %v203_v33 = vld [vmem:[#allocation5 + $0x300] sm:$0xff]  ;;  %v204_v35 = vld [vmem:[#allocation5 + $0x308] sm:$0xff]  ;;  %v4027_v37 = vcombine.low %v195_v25, %v199_v26  ;;  %v4029_v38 = vcombine.low %v196_v27, %v200_v28 }
  0x75   :  { %2516 = vmatpush1.bf16.msra.mxu0 %v3979_v50  ;;  %2688 = vmatpush1.bf16.msra.mxu1 %v3981_v51  ;;  %v207_v34 = vld [vmem:[#allocation5 + $0x320] sm:$0xff]  ;;  %v208_v36 = vld [vmem:[#allocation5 + $0x328] sm:$0xff] }
  0x76   :  { %2517 = vmatprep.subr.bf16.mxu0 %v3988_v52  ;;  %2689 = vmatprep.subr.bf16.mxu1 %v3990_v55  ;;  %v4036_v39 = vcombine.high %v203_v33, %v207_v34  ;;  %v4038_v40 = vcombine.high %v204_v35, %v208_v36  ;;  %v211_v41 = vld [vmem:[#allocation5 + $0x340] sm:$0xff]  ;;  %v212_v43 = vld [vmem:[#allocation5 + $0x348] sm:$0xff]  ;;  %v4035_v45 = vcombine.low %v203_v33, %v207_v34 }
  0x77   :  { %v215_v42 = vld [vmem:[#allocation5 + $0x360] sm:$0xff]  ;;  %v216_v44 = vld [vmem:[#allocation5 + $0x368] sm:$0xff]  ;;  %v4037_v46 = vcombine.low %v204_v35, %v208_v36 }
  0x78   :  { %v4044_v47 = vcombine.high %v211_v41, %v215_v42  ;;  %v4046_v48 = vcombine.high %v212_v43, %v216_v44  ;;  %v219_v49 = vld [vmem:[#allocation5 + $0x380] sm:$0xff]  ;;  %v220_v51 = vld [vmem:[#allocation5 + $0x388] sm:$0xff]  ;;  %v4043_v53 = vcombine.low %v211_v41, %v215_v42  ;;  %v4045_v54 = vcombine.low %v212_v43, %v216_v44 }
  0x79   :  { %2518 = vmatpush1.bf16.msra.mxu0 %v3987_v61  ;;  %2690 = vmatpush1.bf16.msra.mxu1 %v3989_v62  ;;  %v223_v50 = vld [vmem:[#allocation5 + $0x3a0] sm:$0xff]  ;;  %v224_v52 = vld [vmem:[#allocation5 + $0x3a8] sm:$0xff] }
  0x7a   :  { %2519 = vmatprep.subr.bf16.mxu0 %v3996_v63  ;;  %2691 = vmatprep.subr.bf16.mxu1 %v3998_v0  ;;  %v4052_v55 = vcombine.high %v219_v49, %v223_v50  ;;  %v4054_v56 = vcombine.high %v220_v51, %v224_v52  ;;  %v227_v57 = vld [vmem:[#allocation5 + $0x3c0] sm:$0xff]  ;;  %v228_v60 = vld [vmem:[#allocation5 + $0x3c8] sm:$0xff]  ;;  %v4051_v62 = vcombine.low %v219_v49, %v223_v50 }
  0x7b   :  { %v231_v59 = vld [vmem:[#allocation5 + $0x3e0] sm:$0xff]  ;;  %v232_v61 = vld [vmem:[#allocation5 + $0x3e8] sm:$0xff]  ;;  %v4053_v63 = vcombine.low %v220_v51, %v224_v52 }
  0x7c   :  { %v4060_v0 = vcombine.high %v227_v57, %v231_v59  ;;  %v4062_v1 = vcombine.high %v228_v60, %v232_v61  ;;  %v235_v2 = vld [vmem:[#allocation5 + $0x400] sm:$0xff]  ;;  %v236_v4 = vld [vmem:[#allocation5 + $0x408] sm:$0xff]  ;;  %v4061_v9 = vcombine.low %v228_v60, %v232_v61 }
  0x7d   :  { %2520 = vmatpush1.bf16.msra.mxu0 %v3995_v5  ;;  %2692 = vmatpush1.bf16.msra.mxu1 %v3997_v6  ;;  %v239_v3 = vld [vmem:[#allocation5 + $0x420] sm:$0xff]  ;;  %v240_v5 = vld [vmem:[#allocation5 + $0x428] sm:$0xff]  ;;  %v4059_v6 = vcombine.low %v227_v57, %v231_v59 }
  0x7e   :  { %2521 = vmatprep.subr.bf16.mxu0 %v4004_v7  ;;  %2693 = vmatprep.subr.bf16.mxu1 %v4006_v8  ;;  %v86_v7 = vld [vmem:[#allocation2] sm:$0xff]  ;;  %v93_v8 = vld [vmem:[#allocation2 + $0x38] sm:$0xff]  ;;  %v4068_v10 = vcombine.high %v235_v2, %v239_v3  ;;  %v4070_v11 = vcombine.high %v236_v4, %v240_v5  ;;  %v243_v12 = vld [vmem:[#allocation5 + $0x440] sm:$0xff]  ;;  %v4067_v19 = vcombine.low %v235_v2, %v239_v3 }
  0x7f   :  { %v89_v17 = vld [vmem:[#allocation2 + $0x18] sm:$0xff]  ;;  %v96_v18 = vld [vmem:[#allocation2 + $0x50] sm:$0xff]  ;;  %v4069_v20 = vcombine.low %v236_v4, %v240_v5 }
  0x80   :  { %v4890_v25 = vpack.c.bf16 %v96_v18, %v89_v17  ;;  %v252_v26 = vld [vmem:[#allocation5 + $0x488] sm:$0xff]  ;;  %v263_v33 = vld [vmem:[#allocation5 + $0x4e0] sm:$0xff] }
  0x81   :  { %2522 = vmatpush1.bf16.msra.mxu0 %v4003_v13  ;;  %2694 = vmatpush1.bf16.msra.mxu1 %v4005_v14  ;;  %v247_v13 = vld [vmem:[#allocation5 + $0x460] sm:$0xff]  ;;  %v244_v14 = vld [vmem:[#allocation5 + $0x448] sm:$0xff] }
  0x82   :  { %2523 = vmatprep.subr.bf16.mxu0 %v4012_v15  ;;  %2695 = vmatprep.subr.bf16.mxu1 %v4014_v16  ;;  %v4888_v15 = vpack.c.bf16 %v93_v8, %v86_v7  ;;  %v248_v16 = vld [vmem:[#allocation5 + $0x468] sm:$0xff]  ;;  %v4075_v28 = vcombine.low %v243_v12, %v247_v13  ;;  %v299_v8 = vld [vmem:[#allocation5 + $0x600] sm:$0xff] }
  0x83   :  { %v256_v27 = vld [vmem:[#allocation5 + $0x4a8] sm:$0xff]  ;;  %v307_v17 = vld [vmem:[#allocation5 + $0x640] sm:$0xff] }
  0x84   :  { %v260_v34 = vld [vmem:[#allocation5 + $0x4c8] sm:$0xff]  ;;  %v311_v18 = vld [vmem:[#allocation5 + $0x660] sm:$0xff] }
  0x85   :  { %2524 = vmatpush1.bf16.msra.mxu0 %v4011_v21  ;;  %2696 = vmatpush1.bf16.msra.mxu1 %v4013_v22  ;;  %v4076_v21 = vcombine.high %v243_v12, %v247_v13  ;;  %v4078_v22 = vcombine.high %v244_v14, %v248_v16  ;;  %v264_v35 = vld [vmem:[#allocation5 + $0x4e8] sm:$0xff] }
  0x86   :  { %2525 = vmatprep.subr.bf16.mxu0 %v4020_v23  ;;  %2697 = vmatprep.subr.bf16.mxu1 %v4022_v24  ;;  %v251_v23 = vld [vmem:[#allocation5 + $0x480] sm:$0xff]  ;;  %v268_v41 = vld [vmem:[#allocation5 + $0x508] sm:$0xff]  ;;  %v4094_v43 = vcombine.high %v260_v34, %v264_v35 }
  0x87   :  { %v255_v24 = vld [vmem:[#allocation5 + $0x4a0] sm:$0xff]  ;;  %v272_v42 = vld [vmem:[#allocation5 + $0x528] sm:$0xff] }
  0x88   :  { %v4083_v36 = vcombine.low %v251_v23, %v255_v24  ;;  %v276_v49 = vld [vmem:[#allocation5 + $0x548] sm:$0xff]  ;;  %v4102_v51 = vcombine.high %v268_v41, %v272_v42 }
  0x89   :  { %2526 = vmatpush1.bf16.msra.mxu0 %v4019_v29  ;;  %2698 = vmatpush1.bf16.msra.mxu1 %v4021_v30  ;;  %v4077_v29 = vcombine.low %v244_v14, %v248_v16  ;;  %v4084_v30 = vcombine.high %v251_v23, %v255_v24  ;;  %v280_v50 = vld [vmem:[#allocation5 + $0x568] sm:$0xff]  ;;  %v4140_v24 = vcombine.high %v307_v17, %v311_v18 }
  0x8a   :  { %2527 = vmatprep.subr.bf16.mxu0 %v4028_v31  ;;  %2699 = vmatprep.subr.bf16.mxu1 %v4030_v32  ;;  %v4086_v31 = vcombine.high %v252_v26, %v256_v27  ;;  %v259_v32 = vld [vmem:[#allocation5 + $0x4c0] sm:$0xff]  ;;  %v284_v57 = vld [vmem:[#allocation5 + $0x588] sm:$0xff]  ;;  %v4110_v59 = vcombine.high %v276_v49, %v280_v50 }
  0x8b   :  { %v4091_v44 = vcombine.low %v259_v32, %v263_v33  ;;  %v288_v60 = vld [vmem:[#allocation5 + $0x5a8] sm:$0xff] }
  0x8c   :  { %v292_v2 = vld [vmem:[#allocation5 + $0x5c8] sm:$0xff]  ;;  %v4118_v3 = vcombine.high %v284_v57, %v288_v60 }
  0x8d   :  { %2528 = vmatpush1.bf16.msra.mxu0 %v4027_v37  ;;  %2700 = vmatpush1.bf16.msra.mxu1 %v4029_v38  ;;  %v267_v37 = vld [vmem:[#allocation5 + $0x500] sm:$0xff]  ;;  %v296_v4 = vld [vmem:[#allocation5 + $0x5e8] sm:$0xff] }
  0x8e   :  { %2529 = vmatprep.subr.bf16.mxu0 %v4036_v39  ;;  %2701 = vmatprep.subr.bf16.mxu1 %v4038_v40  ;;  %v271_v38 = vld [vmem:[#allocation5 + $0x520] sm:$0xff]  ;;  %v4085_v39 = vcombine.low %v252_v26, %v256_v27  ;;  %v4092_v40 = vcombine.high %v259_v32, %v263_v33  ;;  %v304_v12 = vld [vmem:[#allocation5 + $0x628] sm:$0xff]  ;;  %v4125_v14 = vcombine.low %v292_v2, %v296_v4 }
  0x8f   :  { %v4099_v52 = vcombine.low %v267_v37, %v271_v38  ;;  %v315_v26 = vld [vmem:[#allocation5 + $0x680] sm:$0xff] }
  0x90   :  { %v319_v27 = vld [vmem:[#allocation5 + $0x6a0] sm:$0xff] }
  0x91   :  { %2530 = vmatpush1.bf16.msra.mxu0 %v4035_v45  ;;  %2702 = vmatpush1.bf16.msra.mxu1 %v4037_v46  ;;  %v275_v45 = vld [vmem:[#allocation5 + $0x540] sm:$0xff]  ;;  %v4148_v33 = vcombine.high %v315_v26, %v319_v27 }
  0x92   :  { %2531 = vmatprep.subr.bf16.mxu0 %v4044_v47  ;;  %2703 = vmatprep.subr.bf16.mxu1 %v4046_v48  ;;  %v279_v46 = vld [vmem:[#allocation5 + $0x560] sm:$0xff]  ;;  %v4093_v47 = vcombine.low %v260_v34, %v264_v35  ;;  %v4100_v48 = vcombine.high %v267_v37, %v271_v38  ;;  %v328_v38 = vld [vmem:[#allocation5 + $0x6e8] sm:$0xff] }
  0x93   :  { %v4107_v61 = vcombine.low %v275_v45, %v279_v46  ;;  %v323_v34 = vld [vmem:[#allocation5 + $0x6c0] sm:$0xff] }
  0x94   :  { %v327_v35 = vld [vmem:[#allocation5 + $0x6e0] sm:$0xff] }
  0x95   :  { %2532 = vmatpush1.bf16.msra.mxu0 %v4043_v53  ;;  %2704 = vmatpush1.bf16.msra.mxu1 %v4045_v54  ;;  %v4101_v53 = vcombine.low %v268_v41, %v272_v42  ;;  %v4108_v54 = vcombine.high %v275_v45, %v279_v46  ;;  %v4156_v41 = vcombine.high %v323_v34, %v327_v35  ;;  %v331_v42 = vld [vmem:[#allocation5 + $0x700] sm:$0xff]  ;;  %v336_v46 = vld [vmem:[#allocation5 + $0x728] sm:$0xff] }
  0x96   :  { %2533 = vmatprep.subr.bf16.mxu0 %v4052_v55  ;;  %2705 = vmatprep.subr.bf16.mxu1 %v4054_v56  ;;  %v283_v55 = vld [vmem:[#allocation5 + $0x580] sm:$0xff] }
  0x97   :  { %v287_v56 = vld [vmem:[#allocation5 + $0x5a0] sm:$0xff] }
  0x98   :  { %v4115_v5 = vcombine.low %v283_v55, %v287_v56 }
  0x99   :  { %2534 = vmatpush1.bf16.msra.mxu0 %v4051_v62  ;;  %2706 = vmatpush1.bf16.msra.mxu1 %v4053_v63  ;;  %v4109_v62 = vcombine.low %v276_v49, %v280_v50  ;;  %v4116_v63 = vcombine.high %v283_v55, %v287_v56  ;;  %v339_v50 = vld [vmem:[#allocation5 + $0x740] sm:$0xff] }
  0x9a   :  { %2535 = vmatprep.subr.bf16.mxu0 %v4060_v0  ;;  %2707 = vmatprep.subr.bf16.mxu1 %v4062_v1  ;;  %v291_v0 = vld [vmem:[#allocation5 + $0x5c0] sm:$0xff] }
  0x9b   :  { %v295_v1 = vld [vmem:[#allocation5 + $0x5e0] sm:$0xff] }
  0x9c   :  { %v4124_v7 = vcombine.high %v291_v0, %v295_v1  ;;  %v4123_v13 = vcombine.low %v291_v0, %v295_v1 }
  0x9d   :  { %2536 = vmatpush1.bf16.msra.mxu0 %v4059_v6  ;;  %2708 = vmatpush1.bf16.msra.mxu1 %v4061_v9  ;;  %v4117_v6 = vcombine.low %v284_v57, %v288_v60  ;;  %v303_v9 = vld [vmem:[#allocation5 + $0x620] sm:$0xff] }
  0x9e   :  { %2548 = vmatprep.subr.bf16.mxu0 %v4068_v10  ;;  %2720 = vmatprep.subr.bf16.mxu1 %v4070_v11  ;;  %v300_v10 = vld [vmem:[#allocation5 + $0x608] sm:$0xff]  ;;  %v4126_v11 = vcombine.high %v292_v2, %v296_v4  ;;  %v4132_v16 = vcombine.high %v299_v8, %v303_v9  ;;  %v351_v60 = vld [vmem:[#allocation5 + $0x7a0] sm:$0xff] }
  0x9f   :  { %v4133_v23 = vcombine.low %v300_v10, %v304_v12  ;;  %v359_v4 = vld [vmem:[#allocation5 + $0x7e0] sm:$0xff] }
  0xa0   :  { %2538 = vmatmul.mubr.bf16.vlgmr.msra.gmra.mrb[0].mxu0 %v4888_v15  ;;  %2710 = vmatmul.mubr.bf16.vlgmr.msra.gmra.mrb[0].mxu1 %v4888_v15 }
  0xa1   :  { %2549 = vmatpush1.bf16.msra.mxu0 %v4067_v19  ;;  %2721 = vmatpush1.bf16.msra.mxu1 %v4069_v20  ;;  %v308_v19 = vld [vmem:[#allocation5 + $0x648] sm:$0xff]  ;;  %v4134_v20 = vcombine.high %v300_v10, %v304_v12  ;;  %v367_v12 = vld [vmem:[#allocation5 + $0x820] sm:$0xff] }
  0xa2   :  { %2550 = vmatprep.subr.bf16.mxu0 %v4076_v21  ;;  %2722 = vmatprep.subr.bf16.mxu1 %v4078_v22  ;;  %v312_v21 = vld [vmem:[#allocation5 + $0x668] sm:$0xff]  ;;  %v4131_v22 = vcombine.low %v299_v8, %v303_v9  ;;  %v363_v9 = vld [vmem:[#allocation5 + $0x800] sm:$0xff] }
  0xa3   :  { %2580 = vmatprep.mubr.bf16.mxu0 %v4890_v25  ;;  %2752 = vmatprep.mubr.bf16.mxu1 %v4890_v25  ;;  %v4141_v32 = vcombine.low %v308_v19, %v312_v21 }
  0xa5   :  { %2551 = vmatpush1.bf16.msra.mxu0 %v4075_v28  ;;  %2723 = vmatpush1.bf16.msra.mxu1 %v4077_v29  ;;  %v316_v28 = vld [vmem:[#allocation5 + $0x688] sm:$0xff]  ;;  %v4142_v29 = vcombine.high %v308_v19, %v312_v21  ;;  %v375_v21 = vld [vmem:[#allocation5 + $0x860] sm:$0xff] }
  0xa6   :  { %2552 = vmatprep.subr.bf16.mxu0 %v4084_v30  ;;  %2724 = vmatprep.subr.bf16.mxu1 %v4086_v31  ;;  %v320_v30 = vld [vmem:[#allocation5 + $0x6a8] sm:$0xff]  ;;  %v4139_v31 = vcombine.low %v307_v17, %v311_v18  ;;  %v88_v17 = vld [vmem:[#allocation2 + $0x10] sm:$0xff]  ;;  %v95_v18 = vld [vmem:[#allocation2 + $0x48] sm:$0xff] }
  0xa7   :  { %v4150_v37 = vcombine.high %v316_v28, %v320_v30 }
  0xa9   :  { %2553 = vmatpush1.bf16.msra.mxu0 %v4083_v36  ;;  %2725 = vmatpush1.bf16.msra.mxu1 %v4085_v39  ;;  %v324_v36 = vld [vmem:[#allocation5 + $0x6c8] sm:$0xff]  ;;  %v4147_v39 = vcombine.low %v315_v26, %v319_v27  ;;  %v91_v27 = vld [vmem:[#allocation2 + $0x28] sm:$0xff] }
  0xaa   :  { %2554 = vmatprep.subr.bf16.mxu0 %v4092_v40  ;;  %2726 = vmatprep.subr.bf16.mxu1 %v4094_v43  ;;  %v4149_v40 = vcombine.low %v316_v28, %v320_v30  ;;  %v335_v43 = vld [vmem:[#allocation5 + $0x720] sm:$0xff]  ;;  %v4158_v45 = vcombine.high %v324_v36, %v328_v38  ;;  %v376_v26 = vld [vmem:[#allocation5 + $0x868] sm:$0xff]  ;;  %v4896_v30 = vpack.c.bf16 %v95_v18, %v88_v17 }
  0xab   :  { %v4164_v49 = vcombine.high %v331_v42, %v335_v43  ;;  %v4163_v55 = vcombine.low %v331_v42, %v335_v43  ;;  %v424_v17 = vld [vmem:[#allocation5 + $0x9e8] sm:$0xff] }
  0xad   :  { %2555 = vmatpush1.bf16.msra.mxu0 %v4091_v44  ;;  %2727 = vmatpush1.bf16.msra.mxu1 %v4093_v47  ;;  %v332_v44 = vld [vmem:[#allocation5 + $0x708] sm:$0xff]  ;;  %v4155_v47 = vcombine.low %v323_v34, %v327_v35  ;;  %v379_v34 = vld [vmem:[#allocation5 + $0x880] sm:$0xff] }
  0xae   :  { %2556 = vmatprep.subr.bf16.mxu0 %v4100_v48  ;;  %2728 = vmatprep.subr.bf16.mxu1 %v4102_v51  ;;  %v4157_v48 = vcombine.low %v324_v36, %v328_v38  ;;  %v343_v51 = vld [vmem:[#allocation5 + $0x760] sm:$0xff]  ;;  %v4165_v56 = vcombine.low %v332_v44, %v336_v46  ;;  %v380_v38 = vld [vmem:[#allocation5 + $0x888] sm:$0xff] }
  0xaf   :  { %v4172_v57 = vcombine.high %v339_v50, %v343_v51  ;;  %v4171_v0 = vcombine.low %v339_v50, %v343_v51  ;;  %v383_v36 = vld [vmem:[#allocation5 + $0x8a0] sm:$0xff] }
  0xb0   :  { %v4212_v42 = vcombine.high %v379_v34, %v383_v36 }
  0xb1   :  { %2557 = vmatpush1.bf16.msra.mxu0 %v4099_v52  ;;  %2729 = vmatpush1.bf16.msra.mxu1 %v4101_v53  ;;  %v340_v52 = vld [vmem:[#allocation5 + $0x748] sm:$0xff]  ;;  %v4166_v53 = vcombine.high %v332_v44, %v336_v46  ;;  %v387_v44 = vld [vmem:[#allocation5 + $0x8c0] sm:$0xff] }
  0xb2   :  { %2558 = vmatprep.subr.bf16.mxu0 %v4108_v54  ;;  %2730 = vmatprep.subr.bf16.mxu1 %v4110_v59  ;;  %v344_v54 = vld [vmem:[#allocation5 + $0x768] sm:$0xff]  ;;  %v347_v59 = vld [vmem:[#allocation5 + $0x780] sm:$0xff] }
  0xb3   :  { %v4173_v1 = vcombine.low %v340_v52, %v344_v54  ;;  %v4180_v2 = vcombine.high %v347_v59, %v351_v60  ;;  %v4179_v8 = vcombine.low %v347_v59, %v351_v60  ;;  %v388_v46 = vld [vmem:[#allocation5 + $0x8c8] sm:$0xff] }
  0xb5   :  { %2559 = vmatpush1.bf16.msra.mxu0 %v4107_v61  ;;  %2731 = vmatpush1.bf16.msra.mxu1 %v4109_v62  ;;  %v348_v61 = vld [vmem:[#allocation5 + $0x788] sm:$0xff]  ;;  %v4174_v62 = vcombine.high %v340_v52, %v344_v54  ;;  %v395_v52 = vld [vmem:[#allocation5 + $0x900] sm:$0xff] }
  0xb6   :  { %2560 = vmatprep.subr.bf16.mxu0 %v4116_v63  ;;  %2732 = vmatprep.subr.bf16.mxu1 %v4118_v3  ;;  %v352_v63 = vld [vmem:[#allocation5 + $0x7a8] sm:$0xff]  ;;  %v355_v3 = vld [vmem:[#allocation5 + $0x7c0] sm:$0xff] }
  0xb7   :  { %v4181_v10 = vcombine.low %v348_v61, %v352_v63  ;;  %v4187_v19 = vcombine.low %v355_v3, %v359_v4  ;;  %v396_v54 = vld [vmem:[#allocation5 + $0x908] sm:$0xff] }
  0xb9   :  { %2561 = vmatpush1.bf16.msra.mxu0 %v4115_v5  ;;  %2733 = vmatpush1.bf16.msra.mxu1 %v4117_v6  ;;  %v356_v5 = vld [vmem:[#allocation5 + $0x7c8] sm:$0xff]  ;;  %v4182_v6 = vcombine.high %v348_v61, %v352_v63  ;;  %v403_v61 = vld [vmem:[#allocation5 + $0x940] sm:$0xff] }
  0xba   :  { %2562 = vmatprep.subr.bf16.mxu0 %v4124_v7  ;;  %2734 = vmatprep.subr.bf16.mxu1 %v4126_v11  ;;  %v360_v7 = vld [vmem:[#allocation5 + $0x7e8] sm:$0xff]  ;;  %v4188_v11 = vcombine.high %v355_v3, %v359_v4 }
  0xbb   :  { %v404_v63 = vld [vmem:[#allocation5 + $0x948] sm:$0xff] }
  0xbd   :  { %2563 = vmatpush1.bf16.msra.mxu0 %v4123_v13  ;;  %2735 = vmatpush1.bf16.msra.mxu1 %v4125_v14  ;;  %v364_v13 = vld [vmem:[#allocation5 + $0x808] sm:$0xff] }
  0xbe   :  { %2564 = vmatprep.subr.bf16.mxu0 %v4132_v16  ;;  %2736 = vmatprep.subr.bf16.mxu1 %v4134_v20  ;;  %v368_v14 = vld [vmem:[#allocation5 + $0x828] sm:$0xff]  ;;  %v4190_v16 = vcombine.high %v356_v5, %v360_v7  ;;  %v371_v20 = vld [vmem:[#allocation5 + $0x840] sm:$0xff] }
  0xbf   :  { %v4198_v28 = vcombine.high %v364_v13, %v368_v14 }
  0xc1   :  { %2565 = vmatpush1.bf16.msra.mxu0 %v4131_v22  ;;  %2737 = vmatpush1.bf16.msra.mxu1 %v4133_v23  ;;  %v4189_v22 = vcombine.low %v356_v5, %v360_v7  ;;  %v4196_v23 = vcombine.high %v363_v9, %v367_v12  ;;  %v411_v5 = vld [vmem:[#allocation5 + $0x980] sm:$0xff]  ;;  %v412_v7 = vld [vmem:[#allocation5 + $0x988] sm:$0xff] }
  0xc2   :  { %2566 = vmatprep.subr.bf16.mxu0 %v4140_v24  ;;  %2738 = vmatprep.subr.bf16.mxu1 %v4142_v29  ;;  %v372_v24 = vld [vmem:[#allocation5 + $0x848] sm:$0xff]  ;;  %v98_v29 = vld [vmem:[#allocation2 + $0x60] sm:$0xff] }
  0xc3   :  { %v4206_v35 = vcombine.high %v372_v24, %v376_v26 }
  0xc5   :  { %2567 = vmatpush1.bf16.msra.mxu0 %v4139_v31  ;;  %2739 = vmatpush1.bf16.msra.mxu1 %v4141_v32  ;;  %v4195_v31 = vcombine.low %v363_v9, %v367_v12  ;;  %v4197_v32 = vcombine.low %v364_v13, %v368_v14  ;;  %v419_v13 = vld [vmem:[#allocation5 + $0x9c0] sm:$0xff] }
  0xc6   :  { %2568 = vmatprep.subr.bf16.mxu0 %v4148_v33  ;;  %2740 = vmatprep.subr.bf16.mxu1 %v4150_v37  ;;  %v4204_v33 = vcombine.high %v371_v20, %v375_v21  ;;  %v4898_v37 = vpack.c.bf16 %v98_v29, %v91_v27  ;;  %v423_v14 = vld [vmem:[#allocation5 + $0x9e0] sm:$0xff] }
  0xc7   :  { %v4251_v27 = vcombine.low %v419_v13, %v423_v14 }
  0xc9   :  { %2569 = vmatpush1.bf16.msra.mxu0 %v4147_v39  ;;  %2741 = vmatpush1.bf16.msra.mxu1 %v4149_v40  ;;  %v384_v39 = vld [vmem:[#allocation5 + $0x8a8] sm:$0xff]  ;;  %v4203_v40 = vcombine.low %v371_v20, %v375_v21  ;;  %v4252_v20 = vcombine.high %v419_v13, %v423_v14 }
  0xca   :  { %2570 = vmatprep.subr.bf16.mxu0 %v4156_v41  ;;  %2742 = vmatprep.subr.bf16.mxu1 %v4158_v45  ;;  %v4205_v41 = vcombine.low %v372_v24, %v376_v26  ;;  %v4214_v43 = vcombine.high %v380_v38, %v384_v39  ;;  %v391_v45 = vld [vmem:[#allocation5 + $0x8e0] sm:$0xff]  ;;  %v428_v24 = vld [vmem:[#allocation5 + $0xa08] sm:$0xff] }
  0xcb   :  { %v4220_v50 = vcombine.high %v387_v44, %v391_v45  ;;  %v432_v26 = vld [vmem:[#allocation5 + $0xa28] sm:$0xff] }
  0xcc   :  { %v480_v13 = vld [vmem:[#allocation5 + $0xba8] sm:$0xff] }
  0xcd   :  { %2571 = vmatpush1.bf16.msra.mxu0 %v4155_v47  ;;  %2743 = vmatpush1.bf16.msra.mxu1 %v4157_v48  ;;  %v392_v47 = vld [vmem:[#allocation5 + $0x8e8] sm:$0xff]  ;;  %v4211_v48 = vcombine.low %v379_v34, %v383_v36 }
  0xce   :  { %2572 = vmatprep.subr.bf16.mxu0 %v4164_v49  ;;  %2744 = vmatprep.subr.bf16.mxu1 %v4166_v53  ;;  %v4213_v49 = vcombine.low %v380_v38, %v384_v39  ;;  %v4222_v51 = vcombine.high %v388_v46, %v392_v47  ;;  %v399_v53 = vld [vmem:[#allocation5 + $0x920] sm:$0xff]  ;;  %v436_v34 = vld [vmem:[#allocation5 + $0xa48] sm:$0xff]  ;;  %v4261_v38 = vcombine.low %v428_v24, %v432_v26 }
  0xcf   :  { %v4228_v59 = vcombine.high %v395_v52, %v399_v53 }
  0xd1   :  { %2573 = vmatpush1.bf16.msra.mxu0 %v4163_v55  ;;  %2745 = vmatpush1.bf16.msra.mxu1 %v4165_v56  ;;  %v400_v55 = vld [vmem:[#allocation5 + $0x928] sm:$0xff]  ;;  %v4219_v56 = vcombine.low %v387_v44, %v391_v45 }
  0xd2   :  { %2574 = vmatprep.subr.bf16.mxu0 %v4172_v57  ;;  %2746 = vmatprep.subr.bf16.mxu1 %v4174_v62  ;;  %v4221_v57 = vcombine.low %v388_v46, %v392_v47  ;;  %v4230_v60 = vcombine.high %v396_v54, %v400_v55  ;;  %v407_v62 = vld [vmem:[#allocation5 + $0x960] sm:$0xff]  ;;  %v448_v44 = vld [vmem:[#allocation5 + $0xaa8] sm:$0xff] }
  0xd3   :  { %v4236_v3 = vcombine.high %v403_v61, %v407_v62  ;;  %v4235_v9 = vcombine.low %v403_v61, %v407_v62  ;;  %v464_v61 = vld [vmem:[#allocation5 + $0xb28] sm:$0xff] }
  0xd5   :  { %2575 = vmatpush1.bf16.msra.mxu0 %v4171_v0  ;;  %2747 = vmatpush1.bf16.msra.mxu1 %v4173_v1  ;;  %v408_v0 = vld [vmem:[#allocation5 + $0x968] sm:$0xff]  ;;  %v4227_v1 = vcombine.low %v395_v52, %v399_v53 }
  0xd6   :  { %2576 = vmatprep.subr.bf16.mxu0 %v4180_v2  ;;  %2748 = vmatprep.subr.bf16.mxu1 %v4182_v6  ;;  %v4229_v2 = vcombine.low %v396_v54, %v400_v55  ;;  %v4238_v4 = vcombine.high %v404_v63, %v408_v0  ;;  %v415_v6 = vld [vmem:[#allocation5 + $0x9a0] sm:$0xff]  ;;  %v456_v52 = vld [vmem:[#allocation5 + $0xae8] sm:$0xff] }
  0xd7   :  { %v4243_v18 = vcombine.low %v411_v5, %v415_v6 }
  0xd9   :  { %2577 = vmatpush1.bf16.msra.mxu0 %v4179_v8  ;;  %2749 = vmatpush1.bf16.msra.mxu1 %v4181_v10  ;;  %v416_v8 = vld [vmem:[#allocation5 + $0x9a8] sm:$0xff]  ;;  %v4237_v10 = vcombine.low %v404_v63, %v408_v0 }
  0xda   :  { %2578 = vmatprep.subr.bf16.mxu0 %v4188_v11  ;;  %2750 = vmatprep.subr.bf16.mxu1 %v4190_v16  ;;  %v4244_v11 = vcombine.high %v411_v5, %v415_v6  ;;  %v4246_v12 = vcombine.high %v412_v7, %v416_v8  ;;  %v420_v16 = vld [vmem:[#allocation5 + $0x9c8] sm:$0xff] }
  0xdb   :  { %v4254_v21 = vcombine.high %v420_v16, %v424_v17  ;;  %v472_v5 = vld [vmem:[#allocation5 + $0xb68] sm:$0xff] }
  0xdd   :  { %2579 = vmatpush1.bf16.msra.mxu0 %v4187_v19  ;;  %2751 = vmatpush1.bf16.msra.mxu1 %v4189_v22  ;;  %v4245_v19 = vcombine.low %v412_v7, %v416_v8  ;;  %v427_v22 = vld [vmem:[#allocation5 + $0xa00] sm:$0xff] }
  0xde   :  { %2591 = vmatprep.subr.bf16.mxu0 %v4196_v23  ;;  %2763 = vmatprep.subr.bf16.mxu1 %v4198_v28  ;;  %v431_v23 = vld [vmem:[#allocation5 + $0xa20] sm:$0xff]  ;;  %v4253_v28 = vcombine.low %v420_v16, %v424_v17 }
  0xdf   :  { %v4260_v29 = vcombine.high %v427_v22, %v431_v23  ;;  %v4259_v36 = vcombine.low %v427_v22, %v431_v23  ;;  %v488_v22 = vld [vmem:[#allocation5 + $0xbe8] sm:$0xff] }
  0xe0   :  { %2581 = vmatmul.mubr.bf16.vlgmr.msra.gmra.mrb[0].mxu0 %v4896_v30  ;;  %2753 = vmatmul.mubr.bf16.vlgmr.msra.gmra.mrb[0].mxu1 %v4896_v30 }
  0xe1   :  { %2592 = vmatpush1.bf16.msra.mxu0 %v4195_v31  ;;  %2764 = vmatpush1.bf16.msra.mxu1 %v4197_v32  ;;  %v4262_v31 = vcombine.high %v428_v24, %v432_v26  ;;  %v435_v32 = vld [vmem:[#allocation5 + $0xa40] sm:$0xff] }
  0xe2   :  { %2593 = vmatprep.subr.bf16.mxu0 %v4204_v33  ;;  %2765 = vmatprep.subr.bf16.mxu1 %v4206_v35  ;;  %v439_v33 = vld [vmem:[#allocation5 + $0xa60] sm:$0xff]  ;;  %v440_v35 = vld [vmem:[#allocation5 + $0xa68] sm:$0xff] }
  0xe3   :  { %2623 = vmatprep.mubr.bf16.mxu0 %v4898_v37  ;;  %2795 = vmatprep.mubr.bf16.mxu1 %v4898_v37  ;;  %v4268_v39 = vcombine.high %v435_v32, %v439_v33  ;;  %v4267_v45 = vcombine.low %v435_v32, %v439_v33  ;;  %v4269_v46 = vcombine.low %v436_v34, %v440_v35  ;;  %v496_v32 = vld [vmem:[#allocation5 + $0xc28] sm:$0xff] }
  0xe5   :  { %2594 = vmatpush1.bf16.msra.mxu0 %v4203_v40  ;;  %2766 = vmatpush1.bf16.msra.mxu1 %v4205_v41  ;;  %v4270_v40 = vcombine.high %v436_v34, %v440_v35  ;;  %v443_v41 = vld [vmem:[#allocation5 + $0xa80] sm:$0xff]  ;;  %v90_v34 = vld [vmem:[#allocation2 + $0x20] sm:$0xff]  ;;  %v97_v35 = vld [vmem:[#allocation2 + $0x58] sm:$0xff] }
  0xe6   :  { %2595 = vmatprep.subr.bf16.mxu0 %v4212_v42  ;;  %2767 = vmatprep.subr.bf16.mxu1 %v4214_v43  ;;  %v447_v42 = vld [vmem:[#allocation5 + $0xaa0] sm:$0xff]  ;;  %v444_v43 = vld [vmem:[#allocation5 + $0xa88] sm:$0xff] }
  0xe7   :  { %v4276_v47 = vcombine.high %v443_v41, %v447_v42  ;;  %v4275_v53 = vcombine.low %v443_v41, %v447_v42  ;;  %v4277_v54 = vcombine.low %v444_v43, %v448_v44  ;;  %v109_v41 = vld [vmem:[#allocation5 + $0x10] sm:$0xff] }
  0xe8   :  { %v113_v42 = vld [vmem:[#allocation5 + $0x30] sm:$0xff] }
  0xe9   :  { %2596 = vmatpush1.bf16.msra.mxu0 %v4211_v48  ;;  %2768 = vmatpush1.bf16.msra.mxu1 %v4213_v49  ;;  %v4278_v48 = vcombine.high %v444_v43, %v448_v44  ;;  %v451_v49 = vld [vmem:[#allocation5 + $0xac0] sm:$0xff]  ;;  %v110_v44 = vld [vmem:[#allocation5 + $0x18] sm:$0xff] }
  0xea   :  { %2597 = vmatprep.subr.bf16.mxu0 %v4220_v50  ;;  %2769 = vmatprep.subr.bf16.mxu1 %v4222_v51  ;;  %v455_v50 = vld [vmem:[#allocation5 + $0xae0] sm:$0xff]  ;;  %v452_v51 = vld [vmem:[#allocation5 + $0xac8] sm:$0xff] }
  0xeb   :  { %v4284_v55 = vcombine.high %v451_v49, %v455_v50  ;;  %v4283_v62 = vcombine.low %v451_v49, %v455_v50  ;;  %v4285_v63 = vcombine.low %v452_v51, %v456_v52  ;;  %v4790_v49 = vmov 0   ;;  %v92_v50 = vld [vmem:[#allocation2 + $0x30] sm:$0xff] }
  0xed   :  { %2598 = vmatpush1.bf16.msra.mxu0 %v4219_v56  ;;  %2770 = vmatpush1.bf16.msra.mxu1 %v4221_v57  ;;  %v4286_v56 = vcombine.high %v452_v51, %v456_v52  ;;  %v459_v57 = vld [vmem:[#allocation5 + $0xb00] sm:$0xff]  ;;  %v99_v51 = vld [vmem:[#allocation2 + $0x68] sm:$0xff]  ;;  %v117_v52 = vld [vmem:[#allocation5 + $0x50] sm:$0xff] }
  0xee   :  { %2599 = vmatprep.subr.bf16.mxu0 %v4228_v59  ;;  %2771 = vmatprep.subr.bf16.mxu1 %v4230_v60  ;;  %v463_v59 = vld [vmem:[#allocation5 + $0xb20] sm:$0xff]  ;;  %v460_v60 = vld [vmem:[#allocation5 + $0xb08] sm:$0xff] }
  0xef   :  { %v4292_v0 = vcombine.high %v459_v57, %v463_v59  ;;  %v4291_v6 = vcombine.low %v459_v57, %v463_v59  ;;  %v4293_v7 = vcombine.low %v460_v60, %v464_v61  ;;  %v3943_v57 = vcombine.low %v109_v41, %v113_v42 }
  0xf1   :  { %2600 = vmatpush1.bf16.msra.mxu0 %v4227_v1  ;;  %2772 = vmatpush1.bf16.msra.mxu1 %v4229_v2  ;;  %v4294_v1 = vcombine.high %v460_v60, %v464_v61  ;;  %v467_v2 = vld [vmem:[#allocation5 + $0xb40] sm:$0xff] }
  0xf2   :  { %2601 = vmatprep.subr.bf16.mxu0 %v4236_v3  ;;  %2773 = vmatprep.subr.bf16.mxu1 %v4238_v4  ;;  %v471_v3 = vld [vmem:[#allocation5 + $0xb60] sm:$0xff]  ;;  %v468_v4 = vld [vmem:[#allocation5 + $0xb48] sm:$0xff] }
  0xf3   :  { %v4300_v8 = vcombine.high %v467_v2, %v471_v3  ;;  %v4299_v14 = vcombine.low %v467_v2, %v471_v3  ;;  %v4301_v16 = vcombine.low %v468_v4, %v472_v5 }
  0xf5   :  { %2602 = vmatpush1.bf16.msra.mxu0 %v4235_v9  ;;  %2774 = vmatpush1.bf16.msra.mxu1 %v4237_v10  ;;  %v4302_v9 = vcombine.high %v468_v4, %v472_v5  ;;  %v475_v10 = vld [vmem:[#allocation5 + $0xb80] sm:$0xff] }
  0xf6   :  { %2603 = vmatprep.subr.bf16.mxu0 %v4244_v11  ;;  %2775 = vmatprep.subr.bf16.mxu1 %v4246_v12  ;;  %v479_v11 = vld [vmem:[#allocation5 + $0xba0] sm:$0xff]  ;;  %v476_v12 = vld [vmem:[#allocation5 + $0xb88] sm:$0xff] }
  0xf7   :  { %v4308_v17 = vcombine.high %v475_v10, %v479_v11  ;;  %v4307_v23 = vcombine.low %v475_v10, %v479_v11  ;;  %v4309_v24 = vcombine.low %v476_v12, %v480_v13 }
  0xf9   :  { %2604 = vmatpush1.bf16.msra.mxu0 %v4243_v18  ;;  %2776 = vmatpush1.bf16.msra.mxu1 %v4245_v19  ;;  %v4310_v18 = vcombine.high %v476_v12, %v480_v13  ;;  %v483_v19 = vld [vmem:[#allocation5 + $0xbc0] sm:$0xff] }
  0xfa   :  { %2605 = vmatprep.subr.bf16.mxu0 %v4252_v20  ;;  %2777 = vmatprep.subr.bf16.mxu1 %v4254_v21  ;;  %v487_v20 = vld [vmem:[#allocation5 + $0xbe0] sm:$0xff]  ;;  %v484_v21 = vld [vmem:[#allocation5 + $0xbc8] sm:$0xff] }
  0xfb   :  { %v4316_v26 = vcombine.high %v483_v19, %v487_v20  ;;  %v4315_v33 = vcombine.low %v483_v19, %v487_v20 }
  0xfd   :  { %2606 = vmatpush1.bf16.msra.mxu0 %v4251_v27  ;;  %2778 = vmatpush1.bf16.msra.mxu1 %v4253_v28  ;;  %v4318_v27 = vcombine.high %v484_v21, %v488_v22  ;;  %v491_v28 = vld [vmem:[#allocation5 + $0xc00] sm:$0xff] }
  0xfe   :  { %2607 = vmatprep.subr.bf16.mxu0 %v4260_v29  ;;  %2779 = vmatprep.subr.bf16.mxu1 %v4262_v31  ;;  %v495_v29 = vld [vmem:[#allocation5 + $0xc20] sm:$0xff]  ;;  %v492_v31 = vld [vmem:[#allocation5 + $0xc08] sm:$0xff] }
  0xff   :  { %v4323_v43 = vcombine.low %v491_v28, %v495_v29 }
 0x101   :  { %2608 = vmatpush1.bf16.msra.mxu0 %v4259_v36  ;;  %2780 = vmatpush1.bf16.msra.mxu1 %v4261_v38  ;;  %v4317_v36 = vcombine.low %v484_v21, %v488_v22  ;;  %v4324_v38 = vcombine.high %v491_v28, %v495_v29  ;;  %v149_v22 = vld [vmem:[#allocation5 + $0x150] sm:$0xff] }
 0x102   :  { %2609 = vmatprep.subr.bf16.mxu0 %v4268_v39  ;;  %2781 = vmatprep.subr.bf16.mxu1 %v4270_v40  ;;  %v4326_v39 = vcombine.high %v492_v31, %v496_v32  ;;  %v4904_v40 = vpack.c.bf16 %v97_v35, %v90_v34  ;;  %v158_v34 = vld [vmem:[#allocation5 + $0x198] sm:$0xff] }
 0x103   :  { %v162_v35 = vld [vmem:[#allocation5 + $0x1b8] sm:$0xff] }
 0x105   :  { %2610 = vmatpush1.bf16.msra.mxu0 %v4267_v45  ;;  %2782 = vmatpush1.bf16.msra.mxu1 %v4269_v46  ;;  %v114_v45 = vld [vmem:[#allocation5 + $0x38] sm:$0xff]  ;;  %v4325_v46 = vcombine.low %v492_v31, %v496_v32  ;;  %v157_v32 = vld [vmem:[#allocation5 + $0x190] sm:$0xff] }
 0x106   :  { %2611 = vmatprep.subr.bf16.mxu0 %v4276_v47  ;;  %2783 = vmatprep.subr.bf16.mxu1 %v4278_v48  ;;  %v3944_v47 = vcombine.high %v109_v41, %v113_v42  ;;  %v3946_v48 = vcombine.high %v110_v44, %v114_v45  ;;  %v3945_v59 = vcombine.low %v110_v44, %v114_v45  ;;  %v165_v42 = vld [vmem:[#allocation5 + $0x1d0] sm:$0xff]  ;;  %v166_v44 = vld [vmem:[#allocation5 + $0x1d8] sm:$0xff] }
 0x107   :  { %v3994_v41 = vcombine.high %v158_v34, %v162_v35  ;;  %v170_v45 = vld [vmem:[#allocation5 + $0x1f8] sm:$0xff] }
 0x109   :  { %2612 = vmatpush1.bf16.msra.mxu0 %v4275_v53  ;;  %2784 = vmatpush1.bf16.msra.mxu1 %v4277_v54  ;;  %v121_v53 = vld [vmem:[#allocation5 + $0x70] sm:$0xff]  ;;  %v4910_v54 = vpack.c.bf16 %v99_v51, %v92_v50  ;;  %v4002_v50 = vcombine.high %v166_v44, %v170_v45 }
 0x10a   :  { %2613 = vmatprep.subr.bf16.mxu0 %v4284_v55  ;;  %2785 = vmatprep.subr.bf16.mxu1 %v4286_v56  ;;  %v118_v55 = vld [vmem:[#allocation5 + $0x58] sm:$0xff]  ;;  %v3952_v60 = vcombine.high %v117_v52, %v121_v53  ;;  %v3951_v2 = vcombine.low %v117_v52, %v121_v53  ;;  %v173_v51 = vld [vmem:[#allocation5 + $0x210] sm:$0xff] }
 0x10b   :  { %v122_v56 = vld [vmem:[#allocation5 + $0x78] sm:$0xff]  ;;  %v177_v52 = vld [vmem:[#allocation5 + $0x230] sm:$0xff] }
 0x10c   :  { %v3954_v61 = vcombine.high %v118_v55, %v122_v56  ;;  %v3953_v3 = vcombine.low %v118_v55, %v122_v56  ;;  %v174_v53 = vld [vmem:[#allocation5 + $0x218] sm:$0xff] }
 0x10d   :  { %2614 = vmatpush1.bf16.msra.mxu0 %v4283_v62  ;;  %2786 = vmatpush1.bf16.msra.mxu1 %v4285_v63  ;;  %v125_v62 = vld [vmem:[#allocation5 + $0x90] sm:$0xff]  ;;  %v178_v55 = vld [vmem:[#allocation5 + $0x238] sm:$0xff] }
 0x10e   :  { %2615 = vmatprep.subr.bf16.mxu0 %v4292_v0  ;;  %2787 = vmatprep.subr.bf16.mxu1 %v4294_v1  ;;  %v129_v63 = vld [vmem:[#allocation5 + $0xb0] sm:$0xff]  ;;  %v126_v0 = vld [vmem:[#allocation5 + $0x98] sm:$0xff] }
 0x10f   :  { %v130_v1 = vld [vmem:[#allocation5 + $0xb8] sm:$0xff]  ;;  %v3960_v4 = vcombine.high %v125_v62, %v129_v63  ;;  %v3959_v10 = vcombine.low %v125_v62, %v129_v63  ;;  %v185_v62 = vld [vmem:[#allocation5 + $0x270] sm:$0xff] }
 0x110   :  { %v3962_v5 = vcombine.high %v126_v0, %v130_v1  ;;  %v3961_v11 = vcombine.low %v126_v0, %v130_v1  ;;  %v182_v63 = vld [vmem:[#allocation5 + $0x258] sm:$0xff]  ;;  %v4007_v1 = vcombine.low %v173_v51, %v177_v52 }
 0x111   :  { %2616 = vmatpush1.bf16.msra.mxu0 %v4291_v6  ;;  %2788 = vmatpush1.bf16.msra.mxu1 %v4293_v7  ;;  %v133_v6 = vld [vmem:[#allocation5 + $0xd0] sm:$0xff]  ;;  %v186_v0 = vld [vmem:[#allocation5 + $0x278] sm:$0xff] }
 0x112   :  { %2617 = vmatprep.subr.bf16.mxu0 %v4300_v8  ;;  %2789 = vmatprep.subr.bf16.mxu1 %v4302_v9  ;;  %v137_v7 = vld [vmem:[#allocation5 + $0xf0] sm:$0xff]  ;;  %v134_v8 = vld [vmem:[#allocation5 + $0xd8] sm:$0xff] }
 0x113   :  { %v138_v9 = vld [vmem:[#allocation5 + $0xf8] sm:$0xff]  ;;  %v3968_v12 = vcombine.high %v133_v6, %v137_v7  ;;  %v3967_v19 = vcombine.low %v133_v6, %v137_v7  ;;  %v193_v6 = vld [vmem:[#allocation5 + $0x2b0] sm:$0xff] }
 0x114   :  { %v3970_v13 = vcombine.high %v134_v8, %v138_v9  ;;  %v3969_v20 = vcombine.low %v134_v8, %v138_v9  ;;  %v190_v7 = vld [vmem:[#allocation5 + $0x298] sm:$0xff] }
 0x115   :  { %2618 = vmatpush1.bf16.msra.mxu0 %v4299_v14  ;;  %2790 = vmatpush1.bf16.msra.mxu1 %v4301_v16  ;;  %v141_v14 = vld [vmem:[#allocation5 + $0x110] sm:$0xff]  ;;  %v194_v8 = vld [vmem:[#allocation5 + $0x2b8] sm:$0xff] }
 0x116   :  { %2619 = vmatprep.subr.bf16.mxu0 %v4308_v17  ;;  %2791 = vmatprep.subr.bf16.mxu1 %v4310_v18  ;;  %v145_v16 = vld [vmem:[#allocation5 + $0x130] sm:$0xff]  ;;  %v142_v17 = vld [vmem:[#allocation5 + $0x118] sm:$0xff] }
 0x117   :  { %v146_v18 = vld [vmem:[#allocation5 + $0x138] sm:$0xff]  ;;  %v3976_v21 = vcombine.high %v141_v14, %v145_v16 }
 0x118   :  { %v3977_v28 = vcombine.low %v142_v17, %v146_v18 }
 0x119   :  { %2620 = vmatpush1.bf16.msra.mxu0 %v4307_v23  ;;  %2792 = vmatpush1.bf16.msra.mxu1 %v4309_v24  ;;  %v153_v23 = vld [vmem:[#allocation5 + $0x170] sm:$0xff]  ;;  %v150_v24 = vld [vmem:[#allocation5 + $0x158] sm:$0xff] }
 0x11a   :  { %2621 = vmatprep.subr.bf16.mxu0 %v4316_v26  ;;  %2793 = vmatprep.subr.bf16.mxu1 %v4318_v27  ;;  %v154_v26 = vld [vmem:[#allocation5 + $0x178] sm:$0xff]  ;;  %v3975_v27 = vcombine.low %v141_v14, %v145_v16  ;;  %v3984_v29 = vcombine.high %v149_v22, %v153_v23  ;;  %v201_v14 = vld [vmem:[#allocation5 + $0x2f0] sm:$0xff] }
 0x11b   :  { %v3986_v31 = vcombine.high %v150_v24, %v154_v26  ;;  %v198_v16 = vld [vmem:[#allocation5 + $0x2d8] sm:$0xff] }
 0x11d   :  { %2622 = vmatpush1.bf16.msra.mxu0 %v4315_v33  ;;  %2794 = vmatpush1.bf16.msra.mxu1 %v4317_v36  ;;  %v161_v33 = vld [vmem:[#allocation5 + $0x1b0] sm:$0xff]  ;;  %v3983_v36 = vcombine.low %v149_v22, %v153_v23  ;;  %v206_v23 = vld [vmem:[#allocation5 + $0x318] sm:$0xff] }
 0x11e   :  { %2634 = vmatprep.subr.bf16.mxu0 %v4324_v38  ;;  %2806 = vmatprep.subr.bf16.mxu1 %v4326_v39  ;;  %v3985_v38 = vcombine.low %v150_v24, %v154_v26  ;;  %v3992_v39 = vcombine.high %v157_v32, %v161_v33  ;;  %v209_v22 = vld [vmem:[#allocation5 + $0x330] sm:$0xff]  ;;  %v210_v24 = vld [vmem:[#allocation5 + $0x338] sm:$0xff] }
 0x120   :  { %2624 = vmatmul.mubr.bf16.vlgmr.msra.gmra.mrb[0].mxu0 %v4904_v40  ;;  %2796 = vmatmul.mubr.bf16.vlgmr.msra.gmra.mrb[0].mxu1 %v4904_v40 }
 0x121   :  { %2635 = vmatpush1.bf16.msra.mxu0 %v4323_v43  ;;  %2807 = vmatpush1.bf16.msra.mxu1 %v4325_v46  ;;  %v169_v43 = vld [vmem:[#allocation5 + $0x1f0] sm:$0xff]  ;;  %v3991_v46 = vcombine.low %v157_v32, %v161_v33  ;;  %v214_v33 = vld [vmem:[#allocation5 + $0x358] sm:$0xff] }
 0x122   :  { %2666 = vmatprep.mubr.bf16.mxu0 %v4790_v49  ;;  %2838 = vmatprep.mubr.bf16.mxu1 %v4790_v49  ;;  %v3999_v56 = vcombine.low %v165_v42, %v169_v43  ;;  %v217_v32 = vld [vmem:[#allocation5 + $0x370] sm:$0xff] }
 0x123   :  { %2849 = vmatprep.subr.bf16.mxu0 %v3944_v47  ;;  %3021 = vmatprep.subr.bf16.mxu1 %v3946_v48  ;;  %v3993_v47 = vcombine.low %v158_v34, %v162_v35  ;;  %v4000_v48 = vcombine.high %v165_v42, %v169_v43  ;;  %v218_v34 = vld [vmem:[#allocation5 + $0x378] sm:$0xff]  ;;  %v225_v42 = vld [vmem:[#allocation5 + $0x3b0] sm:$0xff] }
 0x124   :  { %v222_v43 = vld [vmem:[#allocation5 + $0x398] sm:$0xff] }
 0x12c   :  { %4331 = vmatmul.mubr.msk.bf16.vlgmr.msra.gmra.mrb[0].mxu0 %vm2501_vm0, %v4910_v54  ;;  %4332 = vmatmul.mubr.msk.bf16.vlgmr.msra.gmra.mrb[0].mxu1 %vm2501_vm0, %v4910_v54 }
 0x12d   :  { %2850 = vmatpush1.bf16.msra.mxu0 %v3943_v57  ;;  %3022 = vmatpush1.bf16.msra.mxu1 %v3945_v59  ;;  %v4001_v57 = vcombine.low %v166_v44, %v170_v45  ;;  %v4008_v59 = vcombine.high %v173_v51, %v177_v52  ;;  %v226_v44 = vld [vmem:[#allocation5 + $0x3b8] sm:$0xff]  ;;  %v233_v51 = vld [vmem:[#allocation5 + $0x3f0] sm:$0xff] }
 0x12e   :  { %2851 = vmatprep.subr.bf16.mxu0 %v3952_v60  ;;  %3023 = vmatprep.subr.bf16.mxu1 %v3954_v61  ;;  %v4010_v60 = vcombine.high %v174_v53, %v178_v55  ;;  %v181_v61 = vld [vmem:[#allocation5 + $0x250] sm:$0xff]  ;;  %v230_v52 = vld [vmem:[#allocation5 + $0x3d8] sm:$0xff] }
 0x12f   :  { %2881 = vmatprep.mubr.bf16.mxu0 %v4884_v58  ;;  %3053 = vmatprep.mubr.bf16.mxu1 %v4884_v58  ;;  %v3978_v58 = vcombine.high %v142_v17, %v146_v18  ;;  %v4015_v9 = vcombine.low %v181_v61, %v185_v62  ;;  %v202_v17 = vld [vmem:[#allocation5 + $0x2f8] sm:$0xff] }
 0x131   :  { %2852 = vmatpush1.bf16.msra.mxu0 %v3951_v2  ;;  %3024 = vmatpush1.bf16.msra.mxu1 %v3953_v3  ;;  %v4009_v2 = vcombine.low %v174_v53, %v178_v55  ;;  %v4016_v3 = vcombine.high %v181_v61, %v185_v62  ;;  %v234_v53 = vld [vmem:[#allocation5 + $0x3f8] sm:$0xff]  ;;  %v241_v61 = vld [vmem:[#allocation5 + $0x430] sm:$0xff] }
 0x132   :  { %2853 = vmatprep.subr.bf16.mxu0 %v3960_v4  ;;  %3025 = vmatprep.subr.bf16.mxu1 %v3962_v5  ;;  %v4018_v4 = vcombine.high %v182_v63, %v186_v0  ;;  %v189_v5 = vld [vmem:[#allocation5 + $0x290] sm:$0xff]  ;;  %v238_v62 = vld [vmem:[#allocation5 + $0x418] sm:$0xff] }
 0x133   :  { %v4023_v18 = vcombine.low %v189_v5, %v193_v6 }
 0x135   :  { %2854 = vmatpush1.bf16.msra.mxu0 %v3959_v10  ;;  %3026 = vmatpush1.bf16.msra.mxu1 %v3961_v11  ;;  %v4017_v10 = vcombine.low %v182_v63, %v186_v0  ;;  %v4024_v11 = vcombine.high %v189_v5, %v193_v6  ;;  %v242_v63 = vld [vmem:[#allocation5 + $0x438] sm:$0xff]  ;;  %v249_v5 = vld [vmem:[#allocation5 + $0x470] sm:$0xff] }
 0x136   :  { %2855 = vmatprep.subr.bf16.mxu0 %v3968_v12  ;;  %3027 = vmatprep.subr.bf16.mxu1 %v3970_v13  ;;  %v4026_v12 = vcombine.high %v190_v7, %v194_v8  ;;  %v197_v13 = vld [vmem:[#allocation5 + $0x2d0] sm:$0xff]  ;;  %v246_v6 = vld [vmem:[#allocation5 + $0x458] sm:$0xff] }
 0x137   :  { %v4031_v26 = vcombine.low %v197_v13, %v201_v14 }
 0x139   :  { %2856 = vmatpush1.bf16.msra.mxu0 %v3967_v19  ;;  %3028 = vmatpush1.bf16.msra.mxu1 %v3969_v20  ;;  %v4025_v19 = vcombine.low %v190_v7, %v194_v8  ;;  %v4032_v20 = vcombine.high %v197_v13, %v201_v14  ;;  %v250_v7 = vld [vmem:[#allocation5 + $0x478] sm:$0xff]  ;;  %v257_v13 = vld [vmem:[#allocation5 + $0x4b0] sm:$0xff] }
 0x13a   :  { %2857 = vmatprep.subr.bf16.mxu0 %v3976_v21  ;;  %3029 = vmatprep.subr.bf16.mxu1 %v3978_v58  ;;  %v4034_v21 = vcombine.high %v198_v16, %v202_v17  ;;  %v205_v58 = vld [vmem:[#allocation5 + $0x310] sm:$0xff]  ;;  %v254_v14 = vld [vmem:[#allocation5 + $0x498] sm:$0xff] }
 0x13b   :  { %v4039_v35 = vcombine.low %v205_v58, %v209_v22 }
 0x13d   :  { %2858 = vmatpush1.bf16.msra.mxu0 %v3975_v27  ;;  %3030 = vmatpush1.bf16.msra.mxu1 %v3977_v28  ;;  %v4033_v27 = vcombine.low %v198_v16, %v202_v17  ;;  %v4040_v28 = vcombine.high %v205_v58, %v209_v22  ;;  %v258_v16 = vld [vmem:[#allocation5 + $0x4b8] sm:$0xff]  ;;  %v265_v58 = vld [vmem:[#allocation5 + $0x4f0] sm:$0xff] }
 0x13e   :  { %2859 = vmatprep.subr.bf16.mxu0 %v3984_v29  ;;  %3031 = vmatprep.subr.bf16.mxu1 %v3986_v31  ;;  %v4042_v29 = vcombine.high %v206_v23, %v210_v24  ;;  %v213_v31 = vld [vmem:[#allocation5 + $0x350] sm:$0xff]  ;;  %v262_v22 = vld [vmem:[#allocation5 + $0x4d8] sm:$0xff] }
 0x13f   :  { %v4047_v45 = vcombine.low %v213_v31, %v217_v32 }
 0x141   :  { %2860 = vmatpush1.bf16.msra.mxu0 %v3983_v36  ;;  %3032 = vmatpush1.bf16.msra.mxu1 %v3985_v38  ;;  %v4041_v36 = vcombine.low %v206_v23, %v210_v24  ;;  %v4048_v38 = vcombine.high %v213_v31, %v217_v32  ;;  %v266_v23 = vld [vmem:[#allocation5 + $0x4f8] sm:$0xff] }
 0x142   :  { %2861 = vmatprep.subr.bf16.mxu0 %v3992_v39  ;;  %3033 = vmatprep.subr.bf16.mxu1 %v3994_v41  ;;  %v4050_v39 = vcombine.high %v214_v33, %v218_v34  ;;  %v221_v41 = vld [vmem:[#allocation5 + $0x390] sm:$0xff]  ;;  %v270_v31 = vld [vmem:[#allocation5 + $0x518] sm:$0xff] }
 0x143   :  { %v4055_v55 = vcombine.low %v221_v41, %v225_v42  ;;  %v274_v32 = vld [vmem:[#allocation5 + $0x538] sm:$0xff] }
 0x145   :  { %2862 = vmatpush1.bf16.msra.mxu0 %v3991_v46  ;;  %3034 = vmatpush1.bf16.msra.mxu1 %v3993_v47  ;;  %v4049_v46 = vcombine.low %v214_v33, %v218_v34  ;;  %v4056_v47 = vcombine.high %v221_v41, %v225_v42  ;;  %v4097_v34 = vcombine.low %v262_v22, %v266_v23  ;;  %v282_v41 = vld [vmem:[#allocation5 + $0x578] sm:$0xff] }
 0x146   :  { %2863 = vmatprep.subr.bf16.mxu0 %v4000_v48  ;;  %3035 = vmatprep.subr.bf16.mxu1 %v4002_v50  ;;  %v4058_v48 = vcombine.high %v222_v43, %v226_v44  ;;  %v229_v50 = vld [vmem:[#allocation5 + $0x3d0] sm:$0xff] }
 0x147   :  { %v4063_v0 = vcombine.low %v229_v50, %v233_v51 }
 0x149   :  { %2864 = vmatpush1.bf16.msra.mxu0 %v3999_v56  ;;  %3036 = vmatpush1.bf16.msra.mxu1 %v4001_v57  ;;  %v4057_v56 = vcombine.low %v222_v43, %v226_v44  ;;  %v4064_v57 = vcombine.high %v229_v50, %v233_v51  ;;  %v4105_v43 = vcombine.low %v270_v31, %v274_v32  ;;  %v290_v50 = vld [vmem:[#allocation5 + $0x5b8] sm:$0xff] }
 0x14a   :  { %2865 = vmatprep.subr.bf16.mxu0 %v4008_v59  ;;  %3037 = vmatprep.subr.bf16.mxu1 %v4010_v60  ;;  %v4066_v59 = vcombine.high %v230_v52, %v234_v53  ;;  %v237_v60 = vld [vmem:[#allocation5 + $0x410] sm:$0xff] }
 0x14b   :  { %v4071_v8 = vcombine.low %v237_v60, %v241_v61 }
 0x14d   :  { %2866 = vmatpush1.bf16.msra.mxu0 %v4007_v1  ;;  %3038 = vmatpush1.bf16.msra.mxu1 %v4009_v2  ;;  %v4065_v1 = vcombine.low %v230_v52, %v234_v53  ;;  %v4072_v2 = vcombine.high %v237_v60, %v241_v61  ;;  %v298_v60 = vld [vmem:[#allocation5 + $0x5f8] sm:$0xff] }
 0x14e   :  { %2867 = vmatprep.subr.bf16.mxu0 %v4016_v3  ;;  %3039 = vmatprep.subr.bf16.mxu1 %v4018_v4  ;;  %v4074_v3 = vcombine.high %v238_v62, %v242_v63  ;;  %v245_v4 = vld [vmem:[#allocation5 + $0x450] sm:$0xff] }
 0x14f   :  { %v4079_v17 = vcombine.low %v245_v4, %v249_v5 }
 0x151   :  { %2868 = vmatpush1.bf16.msra.mxu0 %v4015_v9  ;;  %3040 = vmatpush1.bf16.msra.mxu1 %v4017_v10  ;;  %v4073_v9 = vcombine.low %v238_v62, %v242_v63  ;;  %v4080_v10 = vcombine.high %v245_v4, %v249_v5  ;;  %v306_v4 = vld [vmem:[#allocation5 + $0x638] sm:$0xff] }
 0x152   :  { %2869 = vmatprep.subr.bf16.mxu0 %v4024_v11  ;;  %3041 = vmatprep.subr.bf16.mxu1 %v4026_v12  ;;  %v4082_v11 = vcombine.high %v246_v6, %v250_v7  ;;  %v253_v12 = vld [vmem:[#allocation5 + $0x490] sm:$0xff] }
 0x153   :  { %v4087_v24 = vcombine.low %v253_v12, %v257_v13 }
 0x155   :  { %2870 = vmatpush1.bf16.msra.mxu0 %v4023_v18  ;;  %3042 = vmatpush1.bf16.msra.mxu1 %v4025_v19  ;;  %v4081_v18 = vcombine.low %v246_v6, %v250_v7  ;;  %v4088_v19 = vcombine.high %v253_v12, %v257_v13  ;;  %v314_v12 = vld [vmem:[#allocation5 + $0x678] sm:$0xff] }
 0x156   :  { %2871 = vmatprep.subr.bf16.mxu0 %v4032_v20  ;;  %3043 = vmatprep.subr.bf16.mxu1 %v4034_v21  ;;  %v4090_v20 = vcombine.high %v254_v14, %v258_v16  ;;  %v261_v21 = vld [vmem:[#allocation5 + $0x4d0] sm:$0xff] }
 0x157   :  { %v4095_v33 = vcombine.low %v261_v21, %v265_v58 }
 0x159   :  { %2872 = vmatpush1.bf16.msra.mxu0 %v4031_v26  ;;  %3044 = vmatpush1.bf16.msra.mxu1 %v4033_v27  ;;  %v4096_v26 = vcombine.high %v261_v21, %v265_v58  ;;  %v4098_v27 = vcombine.high %v262_v22, %v266_v23  ;;  %v322_v21 = vld [vmem:[#allocation5 + $0x6b8] sm:$0xff] }
 0x15a   :  { %2873 = vmatprep.subr.bf16.mxu0 %v4040_v28  ;;  %3045 = vmatprep.subr.bf16.mxu1 %v4042_v29  ;;  %v269_v28 = vld [vmem:[#allocation5 + $0x510] sm:$0xff] }
 0x15b   :  { %v273_v29 = vld [vmem:[#allocation5 + $0x530] sm:$0xff] }
 0x15c   :  { %v4103_v42 = vcombine.low %v269_v28, %v273_v29 }
 0x15d   :  { %2874 = vmatpush1.bf16.msra.mxu0 %v4039_v35  ;;  %3046 = vmatpush1.bf16.msra.mxu1 %v4041_v36  ;;  %v4104_v35 = vcombine.high %v269_v28, %v273_v29  ;;  %v277_v36 = vld [vmem:[#allocation5 + $0x550] sm:$0xff]  ;;  %v330_v28 = vld [vmem:[#allocation5 + $0x6f8] sm:$0xff] }
 0x15e   :  { %2875 = vmatprep.subr.bf16.mxu0 %v4048_v38  ;;  %3047 = vmatprep.subr.bf16.mxu1 %v4050_v39  ;;  %v281_v38 = vld [vmem:[#allocation5 + $0x570] sm:$0xff]  ;;  %v278_v39 = vld [vmem:[#allocation5 + $0x558] sm:$0xff] }
 0x15f   :  { %v4112_v44 = vcombine.high %v277_v36, %v281_v38  ;;  %v4111_v51 = vcombine.low %v277_v36, %v281_v38  ;;  %v4113_v52 = vcombine.low %v278_v39, %v282_v41  ;;  %v338_v36 = vld [vmem:[#allocation5 + $0x738] sm:$0xff] }
 0x161   :  { %2876 = vmatpush1.bf16.msra.mxu0 %v4047_v45  ;;  %3048 = vmatpush1.bf16.msra.mxu1 %v4049_v46  ;;  %v4114_v45 = vcombine.high %v278_v39, %v282_v41  ;;  %v285_v46 = vld [vmem:[#allocation5 + $0x590] sm:$0xff] }
 0x162   :  { %2877 = vmatprep.subr.bf16.mxu0 %v4056_v47  ;;  %3049 = vmatprep.subr.bf16.mxu1 %v4058_v48  ;;  %v289_v47 = vld [vmem:[#allocation5 + $0x5b0] sm:$0xff]  ;;  %v286_v48 = vld [vmem:[#allocation5 + $0x598] sm:$0xff] }
 0x163   :  { %v4120_v53 = vcombine.high %v285_v46, %v289_v47  ;;  %v4119_v61 = vcombine.low %v285_v46, %v289_v47  ;;  %v4121_v62 = vcombine.low %v286_v48, %v290_v50  ;;  %v346_v46 = vld [vmem:[#allocation5 + $0x778] sm:$0xff] }
 0x165   :  { %2878 = vmatpush1.bf16.msra.mxu0 %v4055_v55  ;;  %3050 = vmatpush1.bf16.msra.mxu1 %v4057_v56  ;;  %v4122_v55 = vcombine.high %v286_v48, %v290_v50  ;;  %v293_v56 = vld [vmem:[#allocation5 + $0x5d0] sm:$0xff] }
 0x166   :  { %2879 = vmatprep.subr.bf16.mxu0 %v4064_v57  ;;  %3051 = vmatprep.subr.bf16.mxu1 %v4066_v59  ;;  %v297_v57 = vld [vmem:[#allocation5 + $0x5f0] sm:$0xff]  ;;  %v294_v59 = vld [vmem:[#allocation5 + $0x5d8] sm:$0xff] }
 0x167   :  { %v4128_v63 = vcombine.high %v293_v56, %v297_v57  ;;  %v4127_v5 = vcombine.low %v293_v56, %v297_v57  ;;  %v4129_v6 = vcombine.low %v294_v59, %v298_v60  ;;  %v354_v56 = vld [vmem:[#allocation5 + $0x7b8] sm:$0xff] }
 0x169   :  { %2880 = vmatpush1.bf16.msra.mxu0 %v4063_v0  ;;  %3052 = vmatpush1.bf16.msra.mxu1 %v4065_v1  ;;  %v4130_v0 = vcombine.high %v294_v59, %v298_v60  ;;  %v301_v1 = vld [vmem:[#allocation5 + $0x610] sm:$0xff] }
 0x16a   :  { %2892 = vmatprep.subr.bf16.mxu0 %v4072_v2  ;;  %3064 = vmatprep.subr.bf16.mxu1 %v4074_v3  ;;  %v305_v2 = vld [vmem:[#allocation5 + $0x630] sm:$0xff]  ;;  %v302_v3 = vld [vmem:[#allocation5 + $0x618] sm:$0xff] }
 0x16b   :  { %v4136_v7 = vcombine.high %v301_v1, %v305_v2  ;;  %v4135_v13 = vcombine.low %v301_v1, %v305_v2  ;;  %v362_v1 = vld [vmem:[#allocation5 + $0x7f8] sm:$0xff] }
 0x16c   :  { %2882 = vmatmul.mubr.bf16.vlgmr.msra.gmra.mrb[4].mxu0 %v4888_v15  ;;  %3054 = vmatmul.mubr.bf16.vlgmr.msra.gmra.mrb[4].mxu1 %v4888_v15  ;;  %v4089_v15 = vcombine.low %v254_v14, %v258_v16  ;;  %v4137_v14 = vcombine.low %v302_v3, %v306_v4 }
 0x16d   :  { %2893 = vmatpush1.bf16.msra.mxu0 %v4071_v8  ;;  %3065 = vmatpush1.bf16.msra.mxu1 %v4073_v9  ;;  %v4138_v8 = vcombine.high %v302_v3, %v306_v4  ;;  %v309_v9 = vld [vmem:[#allocation5 + $0x650] sm:$0xff] }
 0x16e   :  { %2894 = vmatprep.subr.bf16.mxu0 %v4080_v10  ;;  %3066 = vmatprep.subr.bf16.mxu1 %v4082_v11  ;;  %v313_v10 = vld [vmem:[#allocation5 + $0x670] sm:$0xff]  ;;  %v310_v11 = vld [vmem:[#allocation5 + $0x658] sm:$0xff] }
 0x16f   :  { %2924 = vmatprep.mubr.bf16.mxu0 %v4890_v25  ;;  %3096 = vmatprep.mubr.bf16.mxu1 %v4890_v25  ;;  %v4106_v25 = vcombine.high %v270_v31, %v274_v32  ;;  %v4144_v16 = vcombine.high %v309_v9, %v313_v10  ;;  %v4143_v58 = vcombine.low %v309_v9, %v313_v10  ;;  %v370_v9 = vld [vmem:[#allocation5 + $0x838] sm:$0xff] }
 0x170   :  { %v4145_v22 = vcombine.low %v310_v11, %v314_v12 }
 0x171   :  { %2895 = vmatpush1.bf16.msra.mxu0 %v4079_v17  ;;  %3067 = vmatpush1.bf16.msra.mxu1 %v4081_v18  ;;  %v4146_v17 = vcombine.high %v310_v11, %v314_v12  ;;  %v317_v18 = vld [vmem:[#allocation5 + $0x690] sm:$0xff] }
 0x172   :  { %2896 = vmatprep.subr.bf16.mxu0 %v4088_v19  ;;  %3068 = vmatprep.subr.bf16.mxu1 %v4090_v20  ;;  %v321_v19 = vld [vmem:[#allocation5 + $0x6b0] sm:$0xff]  ;;  %v318_v20 = vld [vmem:[#allocation5 + $0x698] sm:$0xff] }
 0x173   :  { %v4152_v23 = vcombine.high %v317_v18, %v321_v19  ;;  %v4151_v29 = vcombine.low %v317_v18, %v321_v19  ;;  %v4153_v31 = vcombine.low %v318_v20, %v322_v21  ;;  %v378_v18 = vld [vmem:[#allocation5 + $0x878] sm:$0xff] }
 0x175   :  { %2897 = vmatpush1.bf16.msra.mxu0 %v4087_v24  ;;  %3069 = vmatpush1.bf16.msra.mxu1 %v4089_v15  ;;  %v4154_v24 = vcombine.high %v318_v20, %v322_v21  ;;  %v325_v15 = vld [vmem:[#allocation5 + $0x6d0] sm:$0xff] }
 0x176   :  { %2898 = vmatprep.subr.bf16.mxu0 %v4096_v26  ;;  %3070 = vmatprep.subr.bf16.mxu1 %v4098_v27  ;;  %v329_v26 = vld [vmem:[#allocation5 + $0x6f0] sm:$0xff]  ;;  %v326_v27 = vld [vmem:[#allocation5 + $0x6d8] sm:$0xff] }
 0x177   :  { %v4160_v32 = vcombine.high %v325_v15, %v329_v26  ;;  %v4159_v38 = vcombine.low %v325_v15, %v329_v26  ;;  %v4161_v39 = vcombine.low %v326_v27, %v330_v28  ;;  %v386_v15 = vld [vmem:[#allocation5 + $0x8b8] sm:$0xff] }
 0x179   :  { %2899 = vmatpush1.bf16.msra.mxu0 %v4095_v33  ;;  %3071 = vmatpush1.bf16.msra.mxu1 %v4097_v34  ;;  %v4162_v33 = vcombine.high %v326_v27, %v330_v28  ;;  %v333_v34 = vld [vmem:[#allocation5 + $0x710] sm:$0xff] }
 0x17a   :  { %2900 = vmatprep.subr.bf16.mxu0 %v4104_v35  ;;  %3072 = vmatprep.subr.bf16.mxu1 %v4106_v25  ;;  %v337_v35 = vld [vmem:[#allocation5 + $0x730] sm:$0xff]  ;;  %v334_v25 = vld [vmem:[#allocation5 + $0x718] sm:$0xff] }
 0x17b   :  { %v4168_v41 = vcombine.high %v333_v34, %v337_v35  ;;  %v4167_v47 = vcombine.low %v333_v34, %v337_v35  ;;  %v4169_v48 = vcombine.low %v334_v25, %v338_v36  ;;  %v394_v34 = vld [vmem:[#allocation5 + $0x8f8] sm:$0xff] }
 0x17d   :  { %2901 = vmatpush1.bf16.msra.mxu0 %v4103_v42  ;;  %3073 = vmatpush1.bf16.msra.mxu1 %v4105_v43  ;;  %v4170_v42 = vcombine.high %v334_v25, %v338_v36  ;;  %v341_v43 = vld [vmem:[#allocation5 + $0x750] sm:$0xff] }
 0x17e   :  { %2902 = vmatprep.subr.bf16.mxu0 %v4112_v44  ;;  %3074 = vmatprep.subr.bf16.mxu1 %v4114_v45  ;;  %v345_v44 = vld [vmem:[#allocation5 + $0x770] sm:$0xff]  ;;  %v342_v45 = vld [vmem:[#allocation5 + $0x758] sm:$0xff] }
 0x17f   :  { %v4176_v50 = vcombine.high %v341_v43, %v345_v44  ;;  %v4175_v57 = vcombine.low %v341_v43, %v345_v44  ;;  %v4177_v59 = vcombine.low %v342_v45, %v346_v46 }
 0x181   :  { %2903 = vmatpush1.bf16.msra.mxu0 %v4111_v51  ;;  %3075 = vmatpush1.bf16.msra.mxu1 %v4113_v52  ;;  %v4178_v51 = vcombine.high %v342_v45, %v346_v46  ;;  %v349_v52 = vld [vmem:[#allocation5 + $0x790] sm:$0xff] }
 0x182   :  { %2904 = vmatprep.subr.bf16.mxu0 %v4120_v53  ;;  %3076 = vmatprep.subr.bf16.mxu1 %v4122_v55  ;;  %v353_v53 = vld [vmem:[#allocation5 + $0x7b0] sm:$0xff]  ;;  %v350_v55 = vld [vmem:[#allocation5 + $0x798] sm:$0xff] }
 0x183   :  { %v4184_v60 = vcombine.high %v349_v52, %v353_v53  ;;  %v4183_v2 = vcombine.low %v349_v52, %v353_v53  ;;  %v4185_v3 = vcombine.low %v350_v55, %v354_v56  ;;  %v405_v46 = vld [vmem:[#allocation5 + $0x950] sm:$0xff] }
 0x185   :  { %2905 = vmatpush1.bf16.msra.mxu0 %v4119_v61  ;;  %3077 = vmatpush1.bf16.msra.mxu1 %v4121_v62  ;;  %v4186_v61 = vcombine.high %v350_v55, %v354_v56  ;;  %v357_v62 = vld [vmem:[#allocation5 + $0x7d0] sm:$0xff] }
 0x186   :  { %2906 = vmatprep.subr.bf16.mxu0 %v4128_v63  ;;  %3078 = vmatprep.subr.bf16.mxu1 %v4130_v0  ;;  %v361_v63 = vld [vmem:[#allocation5 + $0x7f0] sm:$0xff]  ;;  %v358_v0 = vld [vmem:[#allocation5 + $0x7d8] sm:$0xff] }
 0x187   :  { %v4192_v4 = vcombine.high %v357_v62, %v361_v63  ;;  %v4191_v10 = vcombine.low %v357_v62, %v361_v63  ;;  %v4193_v11 = vcombine.low %v358_v0, %v362_v1  ;;  %v413_v56 = vld [vmem:[#allocation5 + $0x990] sm:$0xff] }
 0x189   :  { %2907 = vmatpush1.bf16.msra.mxu0 %v4127_v5  ;;  %3079 = vmatpush1.bf16.msra.mxu1 %v4129_v6  ;;  %v4194_v5 = vcombine.high %v358_v0, %v362_v1  ;;  %v365_v6 = vld [vmem:[#allocation5 + $0x810] sm:$0xff] }
 0x18a   :  { %2908 = vmatprep.subr.bf16.mxu0 %v4136_v7  ;;  %3080 = vmatprep.subr.bf16.mxu1 %v4138_v8  ;;  %v369_v7 = vld [vmem:[#allocation5 + $0x830] sm:$0xff]  ;;  %v366_v8 = vld [vmem:[#allocation5 + $0x818] sm:$0xff] }
 0x18b   :  { %v4200_v12 = vcombine.high %v365_v6, %v369_v7  ;;  %v4199_v19 = vcombine.low %v365_v6, %v369_v7  ;;  %v4201_v20 = vcombine.low %v366_v8, %v370_v9  ;;  %v421_v1 = vld [vmem:[#allocation5 + $0x9d0] sm:$0xff] }
 0x18d   :  { %2909 = vmatpush1.bf16.msra.mxu0 %v4135_v13  ;;  %3081 = vmatpush1.bf16.msra.mxu1 %v4137_v14  ;;  %v4202_v13 = vcombine.high %v366_v8, %v370_v9  ;;  %v373_v14 = vld [vmem:[#allocation5 + $0x850] sm:$0xff] }
 0x18e   :  { %2910 = vmatprep.subr.bf16.mxu0 %v4144_v16  ;;  %3082 = vmatprep.subr.bf16.mxu1 %v4146_v17  ;;  %v377_v16 = vld [vmem:[#allocation5 + $0x870] sm:$0xff]  ;;  %v374_v17 = vld [vmem:[#allocation5 + $0x858] sm:$0xff] }
 0x18f   :  { %v4208_v21 = vcombine.high %v373_v14, %v377_v16  ;;  %v4207_v26 = vcombine.low %v373_v14, %v377_v16  ;;  %v4209_v27 = vcombine.low %v374_v17, %v378_v18  ;;  %v429_v9 = vld [vmem:[#allocation5 + $0xa10] sm:$0xff] }
 0x191   :  { %2911 = vmatpush1.bf16.msra.mxu0 %v4143_v58  ;;  %3083 = vmatpush1.bf16.msra.mxu1 %v4145_v22  ;;  %v4210_v58 = vcombine.high %v374_v17, %v378_v18  ;;  %v381_v22 = vld [vmem:[#allocation5 + $0x890] sm:$0xff] }
 0x192   :  { %2912 = vmatprep.subr.bf16.mxu0 %v4152_v23  ;;  %3084 = vmatprep.subr.bf16.mxu1 %v4154_v24  ;;  %v385_v23 = vld [vmem:[#allocation5 + $0x8b0] sm:$0xff]  ;;  %v382_v24 = vld [vmem:[#allocation5 + $0x898] sm:$0xff] }
 0x193   :  { %v4216_v28 = vcombine.high %v381_v22, %v385_v23  ;;  %v4215_v35 = vcombine.low %v381_v22, %v385_v23  ;;  %v437_v18 = vld [vmem:[#allocation5 + $0xa50] sm:$0xff] }
 0x195   :  { %2913 = vmatpush1.bf16.msra.mxu0 %v4151_v29  ;;  %3085 = vmatpush1.bf16.msra.mxu1 %v4153_v31  ;;  %v4218_v29 = vcombine.high %v382_v24, %v386_v15  ;;  %v389_v31 = vld [vmem:[#allocation5 + $0x8d0] sm:$0xff] }
 0x196   :  { %2914 = vmatprep.subr.bf16.mxu0 %v4160_v32  ;;  %3086 = vmatprep.subr.bf16.mxu1 %v4162_v33  ;;  %v393_v32 = vld [vmem:[#allocation5 + $0x8f0] sm:$0xff]  ;;  %v390_v33 = vld [vmem:[#allocation5 + $0x8d8] sm:$0xff] }
 0x197   :  { %v4224_v25 = vcombine.high %v389_v31, %v393_v32  ;;  %v4226_v36 = vcombine.high %v390_v33, %v394_v34  ;;  %v4223_v43 = vcombine.low %v389_v31, %v393_v32  ;;  %v4225_v44 = vcombine.low %v390_v33, %v394_v34  ;;  %v453_v34 = vld [vmem:[#allocation5 + $0xad0] sm:$0xff] }
 0x199   :  { %2915 = vmatpush1.bf16.msra.mxu0 %v4159_v38  ;;  %3087 = vmatpush1.bf16.msra.mxu1 %v4161_v39  ;;  %v397_v38 = vld [vmem:[#allocation5 + $0x910] sm:$0xff] }
 0x19a   :  { %2916 = vmatprep.subr.bf16.mxu0 %v4168_v41  ;;  %3088 = vmatprep.subr.bf16.mxu1 %v4170_v42  ;;  %v401_v39 = vld [vmem:[#allocation5 + $0x930] sm:$0xff]  ;;  %v398_v41 = vld [vmem:[#allocation5 + $0x918] sm:$0xff] }
 0x19b   :  { %v402_v42 = vld [vmem:[#allocation5 + $0x938] sm:$0xff]  ;;  %v4232_v45 = vcombine.high %v397_v38, %v401_v39 }
 0x19c   :  { %v4233_v52 = vcombine.low %v398_v41, %v402_v42 }
 0x19d   :  { %2917 = vmatpush1.bf16.msra.mxu0 %v4167_v47  ;;  %3089 = vmatpush1.bf16.msra.mxu1 %v4169_v48  ;;  %v409_v47 = vld [vmem:[#allocation5 + $0x970] sm:$0xff]  ;;  %v406_v48 = vld [vmem:[#allocation5 + $0x958] sm:$0xff] }
 0x19e   :  { %2918 = vmatprep.subr.bf16.mxu0 %v4176_v50  ;;  %3090 = vmatprep.subr.bf16.mxu1 %v4178_v51  ;;  %v410_v50 = vld [vmem:[#allocation5 + $0x978] sm:$0xff]  ;;  %v4231_v51 = vcombine.low %v397_v38, %v401_v39  ;;  %v4240_v53 = vcombine.high %v405_v46, %v409_v47 }
 0x19f   :  { %v4242_v55 = vcombine.high %v406_v48, %v410_v50  ;;  %v4241_v62 = vcombine.low %v406_v48, %v410_v50  ;;  %v469_v50 = vld [vmem:[#allocation5 + $0xb50] sm:$0xff] }
 0x1a1   :  { %2919 = vmatpush1.bf16.msra.mxu0 %v4175_v57  ;;  %3091 = vmatpush1.bf16.msra.mxu1 %v4177_v59  ;;  %v417_v57 = vld [vmem:[#allocation5 + $0x9b0] sm:$0xff]  ;;  %v414_v59 = vld [vmem:[#allocation5 + $0x998] sm:$0xff] }
 0x1a2   :  { %2920 = vmatprep.subr.bf16.mxu0 %v4184_v60  ;;  %3092 = vmatprep.subr.bf16.mxu1 %v4186_v61  ;;  %v418_v60 = vld [vmem:[#allocation5 + $0x9b8] sm:$0xff]  ;;  %v4239_v61 = vcombine.low %v405_v46, %v409_v47  ;;  %v4248_v63 = vcombine.high %v413_v56, %v417_v57 }
 0x1a3   :  { %v4250_v0 = vcombine.high %v414_v59, %v418_v60  ;;  %v4249_v6 = vcombine.low %v414_v59, %v418_v60  ;;  %v477_v60 = vld [vmem:[#allocation5 + $0xb90] sm:$0xff] }
 0x1a5   :  { %2921 = vmatpush1.bf16.msra.mxu0 %v4183_v2  ;;  %3093 = vmatpush1.bf16.msra.mxu1 %v4185_v3  ;;  %v425_v2 = vld [vmem:[#allocation5 + $0x9f0] sm:$0xff]  ;;  %v422_v3 = vld [vmem:[#allocation5 + $0x9d8] sm:$0xff] }
 0x1a6   :  { %2922 = vmatprep.subr.bf16.mxu0 %v4192_v4  ;;  %3094 = vmatprep.subr.bf16.mxu1 %v4194_v5  ;;  %v426_v4 = vld [vmem:[#allocation5 + $0x9f8] sm:$0xff]  ;;  %v4247_v5 = vcombine.low %v413_v56, %v417_v57  ;;  %v4256_v7 = vcombine.high %v421_v1, %v425_v2 }
 0x1a7   :  { %v4258_v8 = vcombine.high %v422_v3, %v426_v4  ;;  %v4257_v14 = vcombine.low %v422_v3, %v426_v4  ;;  %v485_v4 = vld [vmem:[#allocation5 + $0xbd0] sm:$0xff] }
 0x1a9   :  { %2923 = vmatpush1.bf16.msra.mxu0 %v4191_v10  ;;  %3095 = vmatpush1.bf16.msra.mxu1 %v4193_v11  ;;  %v433_v10 = vld [vmem:[#allocation5 + $0xa30] sm:$0xff]  ;;  %v430_v11 = vld [vmem:[#allocation5 + $0xa18] sm:$0xff] }
 0x1aa   :  { %2935 = vmatprep.subr.bf16.mxu0 %v4200_v12  ;;  %3107 = vmatprep.subr.bf16.mxu1 %v4202_v13  ;;  %v434_v12 = vld [vmem:[#allocation5 + $0xa38] sm:$0xff]  ;;  %v4255_v13 = vcombine.low %v421_v1, %v425_v2  ;;  %v4264_v16 = vcombine.high %v429_v9, %v433_v10 }
 0x1ab   :  { %v4266_v17 = vcombine.high %v430_v11, %v434_v12  ;;  %v4265_v22 = vcombine.low %v430_v11, %v434_v12  ;;  %v493_v12 = vld [vmem:[#allocation5 + $0xc10] sm:$0xff] }
 0x1ac   :  { %2925 = vmatmul.mubr.bf16.vlgmr.msra.gmra.mrb[4].mxu0 %v4896_v30  ;;  %3097 = vmatmul.mubr.bf16.vlgmr.msra.gmra.mrb[4].mxu1 %v4896_v30  ;;  %v4217_v30 = vcombine.low %v382_v24, %v386_v15  ;;  %v445_v15 = vld [vmem:[#allocation5 + $0xa90] sm:$0xff] }
 0x1ad   :  { %2936 = vmatpush1.bf16.msra.mxu0 %v4199_v19  ;;  %3108 = vmatpush1.bf16.msra.mxu1 %v4201_v20  ;;  %v441_v19 = vld [vmem:[#allocation5 + $0xa70] sm:$0xff]  ;;  %v438_v20 = vld [vmem:[#allocation5 + $0xa58] sm:$0xff] }
 0x1ae   :  { %2937 = vmatprep.subr.bf16.mxu0 %v4208_v21  ;;  %3109 = vmatprep.subr.bf16.mxu1 %v4210_v58  ;;  %v442_v21 = vld [vmem:[#allocation5 + $0xa78] sm:$0xff]  ;;  %v4263_v58 = vcombine.low %v429_v9, %v433_v10  ;;  %v4272_v23 = vcombine.high %v437_v18, %v441_v19 }
 0x1af   :  { %2967 = vmatprep.mubr.bf16.mxu0 %v4898_v37  ;;  %3139 = vmatprep.mubr.bf16.mxu1 %v4898_v37  ;;  %v4234_v37 = vcombine.high %v398_v41, %v402_v42  ;;  %v4274_v24 = vcombine.high %v438_v20, %v442_v21  ;;  %v4273_v31 = vcombine.low %v438_v20, %v442_v21  ;;  %v461_v42 = vld [vmem:[#allocation5 + $0xb10] sm:$0xff] }
 0x1b1   :  { %2938 = vmatpush1.bf16.msra.mxu0 %v4207_v26  ;;  %3110 = vmatpush1.bf16.msra.mxu1 %v4209_v27  ;;  %v449_v26 = vld [vmem:[#allocation5 + $0xab0] sm:$0xff]  ;;  %v446_v27 = vld [vmem:[#allocation5 + $0xa98] sm:$0xff] }
 0x1b2   :  { %2939 = vmatprep.subr.bf16.mxu0 %v4216_v28  ;;  %3111 = vmatprep.subr.bf16.mxu1 %v4218_v29  ;;  %v450_v28 = vld [vmem:[#allocation5 + $0xab8] sm:$0xff]  ;;  %v4271_v29 = vcombine.low %v437_v18, %v441_v19  ;;  %v4280_v32 = vcombine.high %v445_v15, %v449_v26 }
 0x1b3   :  { %v4282_v33 = vcombine.high %v446_v27, %v450_v28  ;;  %v4281_v38 = vcombine.low %v446_v27, %v450_v28  ;;  %v4570_v27 = vld [vmem:[#allocation8 + $0x80] sm:$0xff]   ;;  %v4571_v28 = vld [vmem:[#allocation8 + $0x48] sm:$0xff]  }
 0x1b5   :  { %2940 = vmatpush1.bf16.msra.mxu0 %v4215_v35  ;;  %3112 = vmatpush1.bf16.msra.mxu1 %v4217_v30  ;;  %v457_v35 = vld [vmem:[#allocation5 + $0xaf0] sm:$0xff]  ;;  %v454_v30 = vld [vmem:[#allocation5 + $0xad8] sm:$0xff] }
 0x1b6   :  { %2941 = vmatprep.subr.bf16.mxu0 %v4224_v25  ;;  %3113 = vmatprep.subr.bf16.mxu1 %v4226_v36  ;;  %v458_v25 = vld [vmem:[#allocation5 + $0xaf8] sm:$0xff]  ;;  %v4279_v36 = vcombine.low %v445_v15, %v449_v26  ;;  %v4288_v39 = vcombine.high %v453_v34, %v457_v35  ;;  %v4569_v26 = vld [vmem:[#allocation8] sm:$0xff]  }
 0x1b7   :  { %v4290_v41 = vcombine.high %v454_v30, %v458_v25  ;;  %v4289_v46 = vcombine.low %v454_v30, %v458_v25  ;;  %v4576_v25 = vld [vmem:[#allocation8 + $0xd0] sm:$0xff]  }
 0x1b9   :  { %2942 = vmatpush1.bf16.msra.mxu0 %v4223_v43  ;;  %3114 = vmatpush1.bf16.msra.mxu1 %v4225_v44  ;;  %v465_v43 = vld [vmem:[#allocation5 + $0xb30] sm:$0xff]  ;;  %v462_v44 = vld [vmem:[#allocation5 + $0xb18] sm:$0xff] }
 0x1ba   :  { %2943 = vmatprep.subr.bf16.mxu0 %v4232_v45  ;;  %3115 = vmatprep.subr.bf16.mxu1 %v4234_v37  ;;  %v466_v45 = vld [vmem:[#allocation5 + $0xb38] sm:$0xff]  ;;  %v4287_v37 = vcombine.low %v453_v34, %v457_v35  ;;  %v4296_v47 = vcombine.high %v461_v42, %v465_v43  ;;  %v4574_v34 = vld [vmem:[#allocation8 + $0x88] sm:$0xff]  }
 0x1bb   :  { %v4298_v48 = vcombine.high %v462_v44, %v466_v45  ;;  %v4297_v56 = vcombine.low %v462_v44, %v466_v45  ;;  %v4575_v35 = vld [vmem:[#allocation8 + $0x50] sm:$0xff]   ;;  %v4580_v45 = vld [vmem:[#allocation8 + $0xd8] sm:$0xff]  }
 0x1bd   :  { %2944 = vmatpush1.bf16.msra.mxu0 %v4231_v51  ;;  %3116 = vmatpush1.bf16.msra.mxu1 %v4233_v52  ;;  %v473_v51 = vld [vmem:[#allocation5 + $0xb70] sm:$0xff]  ;;  %v470_v52 = vld [vmem:[#allocation5 + $0xb58] sm:$0xff] }
 0x1be   :  { %2945 = vmatprep.subr.bf16.mxu0 %v4240_v53  ;;  %3117 = vmatprep.subr.bf16.mxu1 %v4242_v55  ;;  %v474_v53 = vld [vmem:[#allocation5 + $0xb78] sm:$0xff]  ;;  %v4295_v55 = vcombine.low %v461_v42, %v465_v43  ;;  %v4304_v57 = vcombine.high %v469_v50, %v473_v51  ;;  %v4579_v43 = vld [vmem:[#allocation8 + $0x58] sm:$0xff]  }
 0x1bf   :  { %v4306_v59 = vcombine.high %v470_v52, %v474_v53  ;;  %v4305_v1 = vcombine.low %v470_v52, %v474_v53  ;;  %v4581_v53 = vld [vmem:[#allocation8 + $0x18] sm:$0xff]  }
 0x1c1   :  { %2946 = vmatpush1.bf16.msra.mxu0 %v4239_v61  ;;  %3118 = vmatpush1.bf16.msra.mxu1 %v4241_v62  ;;  %v481_v61 = vld [vmem:[#allocation5 + $0xbb0] sm:$0xff]  ;;  %v478_v62 = vld [vmem:[#allocation5 + $0xb98] sm:$0xff] }
 0x1c2   :  { %2947 = vmatprep.subr.bf16.mxu0 %v4248_v63  ;;  %3119 = vmatprep.subr.bf16.mxu1 %v4250_v0  ;;  %v482_v63 = vld [vmem:[#allocation5 + $0xbb8] sm:$0xff]  ;;  %v4303_v0 = vcombine.low %v469_v50, %v473_v51  ;;  %v4312_v2 = vcombine.high %v477_v60, %v481_v61 }
 0x1c3   :  { %v4314_v3 = vcombine.high %v478_v62, %v482_v63  ;;  %v4313_v9 = vcombine.low %v478_v62, %v482_v63 }
 0x1c5   :  { %2948 = vmatpush1.bf16.msra.mxu0 %v4247_v5  ;;  %3120 = vmatpush1.bf16.msra.mxu1 %v4249_v6  ;;  %v489_v5 = vld [vmem:[#allocation5 + $0xbf0] sm:$0xff]  ;;  %v486_v6 = vld [vmem:[#allocation5 + $0xbd8] sm:$0xff] }
 0x1c6   :  { %2949 = vmatprep.subr.bf16.mxu0 %v4256_v7  ;;  %3121 = vmatprep.subr.bf16.mxu1 %v4258_v8  ;;  %v490_v7 = vld [vmem:[#allocation5 + $0xbf8] sm:$0xff]  ;;  %v4311_v8 = vcombine.low %v477_v60, %v481_v61  ;;  %v4320_v10 = vcombine.high %v485_v4, %v489_v5  ;;  %v4582_v60 = vld [vmem:[#allocation8 + $0x98] sm:$0xff]   ;;  %v4583_v61 = vld [vmem:[#allocation8 + $0x60] sm:$0xff]  }
 0x1c7   :  { %v4322_v11 = vcombine.high %v486_v6, %v490_v7  ;;  %v4321_v18 = vcombine.low %v486_v6, %v490_v7 }
 0x1c9   :  { %2950 = vmatpush1.bf16.msra.mxu0 %v4255_v13  ;;  %3122 = vmatpush1.bf16.msra.mxu1 %v4257_v14  ;;  %v497_v13 = vld [vmem:[#allocation5 + $0xc30] sm:$0xff]  ;;  %v494_v14 = vld [vmem:[#allocation5 + $0xc18] sm:$0xff] }
 0x1ca   :  { %2951 = vmatprep.subr.bf16.mxu0 %v4264_v16  ;;  %3123 = vmatprep.subr.bf16.mxu1 %v4266_v17  ;;  %v498_v16 = vld [vmem:[#allocation5 + $0xc38] sm:$0xff]  ;;  %v4319_v17 = vcombine.low %v485_v4, %v489_v5  ;;  %v4328_v19 = vcombine.high %v493_v12, %v497_v13  ;;  %v4327_v21 = vcombine.low %v493_v12, %v497_v13  ;;  %v4586_v13 = vld [vmem:[#allocation8 + $0xa0] sm:$0xff]  }
 0x1cb   :  { %v4330_v20 = vcombine.high %v494_v14, %v498_v16 }
 0x1cd   :  { %2952 = vmatpush1.bf16.msra.mxu0 %v4263_v58  ;;  %3124 = vmatpush1.bf16.msra.mxu1 %v4265_v22  ;;  %v4329_v58 = vcombine.low %v494_v14, %v498_v16  ;;  %v4567_v22 = vld [vmem:[#allocation8 + $0x40] sm:$0xff]  }
 0x1ce   :  { %2953 = vmatprep.subr.bf16.mxu0 %v4272_v23  ;;  %3125 = vmatprep.subr.bf16.mxu1 %v4274_v24  ;;  %v4568_v23 = vld [vmem:[#allocation8 + $0xc0] sm:$0xff]   ;;  %v501_v24 = vlaneseq }
 0x1d0   :  { %v4930_v15 = vshrl.u32 %v501_v24, 7  ;;  %v4594_v24 = vld [vmem:[#allocation8 + $0xb0] sm:$0xff]  }
 0x1d1   :  { %2954 = vmatpush1.bf16.msra.mxu0 %v4271_v29  ;;  %3126 = vmatpush1.bf16.msra.mxu1 %v4273_v31  ;;  %v4572_v29 = vld [vmem:[#allocation8 + $0xc8] sm:$0xff]  }
 0x1d2   :  { %2955 = vmatprep.subr.bf16.mxu0 %v4280_v32  ;;  %3127 = vmatprep.subr.bf16.mxu1 %v4282_v33  ;;  %v4573_v31 = vld [vmem:[#allocation8 + $0x8] sm:$0xff]   ;;  %v511_v32 = vsub.s32 2, %v4930_v15  ;;  %v507_v33 = vsub.s32 1, %v4930_v15  ;;  %v515_v30 = vsub.s32 3, %v4930_v15 }
 0x1d5   :  { %2956 = vmatpush1.bf16.msra.mxu0 %v4279_v36  ;;  %3128 = vmatpush1.bf16.msra.mxu1 %v4281_v38  ;;  %v4577_v38 = vld [vmem:[#allocation8 + $0x10] sm:$0xff]  }
 0x1d6   :  { %2957 = vmatprep.subr.bf16.mxu0 %v4288_v39  ;;  %3129 = vmatprep.subr.bf16.mxu1 %v4290_v41  ;;  %v4578_v41 = vld [vmem:[#allocation8 + $0x90] sm:$0xff]  }
 0x1d9   :  { %2958 = vmatpush1.bf16.msra.mxu0 %v4287_v37  ;;  %3130 = vmatpush1.bf16.msra.mxu1 %v4289_v46 }
 0x1da   :  { %2959 = vmatprep.subr.bf16.mxu0 %v4296_v47  ;;  %3131 = vmatprep.subr.bf16.mxu1 %v4298_v48 }
 0x1dd   :  { %2960 = vmatpush1.bf16.msra.mxu0 %v4295_v55  ;;  %3132 = vmatpush1.bf16.msra.mxu1 %v4297_v56 }
 0x1de   :  { %2961 = vmatprep.subr.bf16.mxu0 %v4304_v57  ;;  %3133 = vmatprep.subr.bf16.mxu1 %v4306_v59 }
 0x1e1   :  { %2962 = vmatpush1.bf16.msra.mxu0 %v4303_v0  ;;  %3134 = vmatpush1.bf16.msra.mxu1 %v4305_v1  ;;  %v4584_v1 = vld [vmem:[#allocation8 + $0xe0] sm:$0xff]  }
 0x1e2   :  { %2963 = vmatprep.subr.bf16.mxu0 %v4312_v2  ;;  %3135 = vmatprep.subr.bf16.mxu1 %v4314_v3 }
 0x1e5   :  { %2964 = vmatpush1.bf16.msra.mxu0 %v4311_v8  ;;  %3136 = vmatpush1.bf16.msra.mxu1 %v4313_v9  ;;  %v4585_v9 = vld [vmem:[#allocation8 + $0x20] sm:$0xff]  }
 0x1e6   :  { %2965 = vmatprep.subr.bf16.mxu0 %v4320_v10  ;;  %3137 = vmatprep.subr.bf16.mxu1 %v4322_v11 }
 0x1e9   :  { %2966 = vmatpush1.bf16.msra.mxu0 %v4319_v17  ;;  %3138 = vmatpush1.bf16.msra.mxu1 %v4321_v18  ;;  %v4587_v17 = vld [vmem:[#allocation8 + $0x68] sm:$0xff]  }
 0x1ea   :  { %2978 = vmatprep.subr.bf16.mxu0 %v4328_v19  ;;  %3150 = vmatprep.subr.bf16.mxu1 %v4330_v20  ;;  %v4588_v18 = vld [vmem:[#allocation8 + $0xe8] sm:$0xff]  }
 0x1eb   :  { %v4589_v20 = vld [vmem:[#allocation8 + $0x28] sm:$0xff]  }
 0x1ec   :  { %2968 = vmatmul.mubr.bf16.vlgmr.msra.gmra.mrb[4].mxu0 %v4904_v40  ;;  %3140 = vmatmul.mubr.bf16.vlgmr.msra.gmra.mrb[4].mxu1 %v4904_v40  ;;  %v503_v40 = vsub.s32 0, %v4930_v15 }
 0x1ed   :  { %2979 = vmatpush1.bf16.msra.mxu0 %v4327_v21  ;;  %3151 = vmatpush1.bf16.msra.mxu1 %v4329_v58  ;;  %v4590_v21 = vld [vmem:[#allocation8 + $0xa8] sm:$0xff]   ;;  %v4591_v58 = vld [vmem:[#allocation8 + $0x70] sm:$0xff]  }
 0x1ee   :  { %3010 = vmatprep.mubr.bf16.mxu0 %v4790_v49  ;;  %3182 = vmatprep.mubr.bf16.mxu1 %v4790_v49  ;;  %v4937_v49 = vld [vmem:[#allocation7] sm:$0xff] }
 0x1ef   :  { %4400 = vmatprep.subr.bf16.mxu0 %v4567_v22  ;;  %4422 = vmatprep.subr.bf16.mxu1 %v4568_v23  ;;  %v504_v36 = vrot.slane %v4937_v49, %v503_v40  ;;  %v508_v39 = vrot.slane %v4937_v49, %v507_v33  ;;  %v516_v42 = vrot.slane %v4937_v49, %v515_v30  ;;  %v4592_v22 = vld [vmem:[#allocation8 + $0xf0] sm:$0xff]   ;;  %v4599_v40 = vld [vmem:[#allocation8 + $0x140] sm:$0xff]   ;;  %v4605_v30 = vld [vmem:[#allocation8 + $0x108] sm:$0xff]  }
 0x1f0   :  { %v4593_v23 = vld [vmem:[#allocation8 + $0x30] sm:$0xff]   ;;  %v4602_v33 = vld [vmem:[#allocation8 + $0x180] sm:$0xff]  }
 0x1f8   :  { %4333 = vmatmul.mubr.msk.bf16.vlgmr.msra.gmra.mrb[4].mxu0 %vm2501_vm0, %v4910_v54  ;;  %4334 = vmatmul.mubr.msk.bf16.vlgmr.msra.gmra.mrb[4].mxu1 %vm2501_vm0, %v4910_v54  ;;  %v512_v54 = vrot.slane %v4937_v49, %v511_v32  ;;  %v4601_v32 = vld [vmem:[#allocation8 + $0x100] sm:$0xff]  }
 0x1f9   :  { %4401 = vmatpush3.bf16.msra.mxu0 %v4569_v26  ;;  %4423 = vmatpush3.bf16.msra.mxu1 %v4570_v27  ;;  %v4595_v26 = vld [vmem:[#allocation8 + $0x78] sm:$0xff]  }
 0x1fa   :  { %4402 = vmatprep.subr.bf16.mxu0 %v4571_v28  ;;  %4424 = vmatprep.subr.bf16.mxu1 %v4572_v29  ;;  %v4596_v27 = vld [vmem:[#allocation8 + $0xf8] sm:$0xff]  }
 0x1fb   :  { %v4597_v28 = vld [vmem:[#allocation8 + $0x38] sm:$0xff]  }
 0x1fc   :  { %v4598_v29 = vld [vmem:[#allocation8 + $0xb8] sm:$0xff]  }
 0x1fd   :  { %4403 = vmatpush3.bf16.msra.mxu0 %v4573_v31  ;;  %4425 = vmatpush3.bf16.msra.mxu1 %v4574_v34  ;;  %v4600_v31 = vld [vmem:[#allocation8 + $0x1c0] sm:$0xff]   ;;  %v4603_v34 = vld [vmem:[#allocation8 + $0x148] sm:$0xff]  }
 0x1fe   :  { %4404 = vmatprep.subr.bf16.mxu0 %v4575_v35  ;;  %4426 = vmatprep.subr.bf16.mxu1 %v4576_v25  ;;  %v4604_v35 = vld [vmem:[#allocation8 + $0x1c8] sm:$0xff]  }
 0x1ff   :  { %v2668_v44 = vpop.f32.mrb[0].mxu0  ;;  %v2840_v46 = vpop.f32.mrb[0].mxu1  ;;  %v4606_v25 = vld [vmem:[#allocation8 + $0x188] sm:$0xff]  }
 0x200   :  { %v4488_v37 = vadd.f32 %v2668_v44, %v504_v36  ;;  %v2670_v47 = vpop.f32.mrb[1].mxu0  ;;  %v4492_v48 = vadd.f32 %v2840_v46, %v512_v54  ;;  %v2842_v51 = vpop.f32.mrb[1].mxu1  ;;  %v4614_v44 = vld [vmem:[#allocation8 + $0x198] sm:$0xff]   ;;  %v4617_v46 = vld [vmem:[#allocation8 + $0x120] sm:$0xff]  }
 0x201   :  { %4405 = vmatpush3.bf16.msra.mxu0 %v4577_v38  ;;  %v4489_v50 = vadd.f32 %v2670_v47, %v508_v39  ;;  %v2672_v52 = vpop.f32.mrb[2].mxu0  ;;  %4427 = vmatpush3.bf16.msra.mxu1 %v4578_v41  ;;  %v4493_v55 = vadd.f32 %v2842_v51, %v516_v42  ;;  %v2844_v57 = vpop.f32.mrb[2].mxu1  ;;  %v4609_v38 = vld [vmem:[#allocation8 + $0x110] sm:$0xff]   ;;  %v4611_v41 = vld [vmem:[#allocation8 + $0x158] sm:$0xff]   ;;  %v4618_v47 = vld [vmem:[#allocation8 + $0x1a0] sm:$0xff]  }
 0x202   :  { %v4490_v56 = vadd.f32 %v2672_v52, %v504_v36  ;;  %v2674_v59 = vpop.f32.mrb[3].mxu0  ;;  %4406 = vmatprep.subr.bf16.mxu0 %v4579_v43  ;;  %v4494_v62 = vadd.f32 %v2844_v57, %v512_v54  ;;  %v2846_v0 = vpop.f32.mrb[3].mxu1  ;;  %4428 = vmatprep.subr.bf16.mxu1 %v4580_v45  ;;  %v3193_v2 = vmax.f32 %v4488_v37, 0.0  ;;  %v3195_v5 = vmax.f32 %v4492_v48, 0.0  ;;  %v4607_v36 = vld [vmem:[#allocation8 + $0x150] sm:$0xff]   ;;  %v4613_v43 = vld [vmem:[#allocation8 + $0x118] sm:$0xff]  }
 0x203   :  { %v4491_v63 = vadd.f32 %v2674_v59, %v508_v39  ;;  %v4495_v4 = vadd.f32 %v2846_v0, %v516_v42  ;;  %v3194_v6 = vmax.f32 %v4489_v50, 0.0  ;;  %v3196_v10 = vmax.f32 %v4493_v55, 0.0  ;;  %v4608_v54 = vld [vmem:[#allocation8 + $0x1d0] sm:$0xff]   ;;  %v4612_v42 = vld [vmem:[#allocation8 + $0x1d8] sm:$0xff]   ;;  %v4615_v45 = vld [vmem:[#allocation8 + $0x160] sm:$0xff]  }
 0x204   :  { %v3201_v3 = vmax.f32 %v4490_v56, 0.0  ;;  %v3203_v7 = vmax.f32 %v4494_v62, 0.0  ;;  %v4610_v39 = vld [vmem:[#allocation8 + $0x190] sm:$0xff]   ;;  %v4616_v37 = vld [vmem:[#allocation8 + $0x1e0] sm:$0xff]   ;;  %v4619_v48 = vld [vmem:[#allocation8 + $0x168] sm:$0xff]   ;;  %v527_v0 = vsub.s32 6, %v4930_v15 }
 0x205   :  { %v3202_v8 = vmax.f32 %v4491_v63, 0.0  ;;  %4407 = vmatpush3.bf16.msra.mxu0 %v4581_v53  ;;  %v3204_v12 = vmax.f32 %v4495_v4, 0.0  ;;  %4429 = vmatpush3.bf16.msra.mxu1 %v4582_v60  ;;  %v4620_v50 = vld [vmem:[#allocation8 + $0x1e8] sm:$0xff]   ;;  %v4623_v53 = vld [vmem:[#allocation8 + $0x170] sm:$0xff]   ;;  %v4627_v59 = vld [vmem:[#allocation8 + $0x178] sm:$0xff]   ;;  %v519_v63 = vsub.s32 4, %v4930_v15 }
 0x206   :  { %v3209_v11 = vpack.c.bf16 %v3201_v3, %v3193_v2  ;;  %4408 = vmatprep.subr.bf16.mxu0 %v4583_v61  ;;  %v3211_v14 = vpack.c.bf16 %v3203_v7, %v3195_v5  ;;  %4430 = vmatprep.subr.bf16.mxu1 %v4584_v1  ;;  %v4621_v51 = vld [vmem:[#allocation8 + $0x128] sm:$0xff]   ;;  %v4624_v55 = vld [vmem:[#allocation8 + $0x1f0] sm:$0xff]   ;;  %v4628_v60 = vld [vmem:[#allocation8 + $0x1f8] sm:$0xff]   ;;  %v523_v1 = vsub.s32 5, %v4930_v15  ;;  %v531_v2 = vsub.s32 7, %v4930_v15 }
 0x207   :  { %v3210_v16 = vpack.c.bf16 %v3202_v8, %v3194_v6  ;;  %v3212_v19 = vpack.c.bf16 %v3204_v12, %v3196_v10  ;;  %v4622_v52 = vld [vmem:[#allocation8 + $0x1a8] sm:$0xff]   ;;  %v4625_v56 = vld [vmem:[#allocation8 + $0x130] sm:$0xff]   ;;  %v4629_v61 = vld [vmem:[#allocation8 + $0x138] sm:$0xff]   ;;  %v520_v3 = vrot.slane %v4937_v49, %v519_v63  ;;  %v528_v4 = vrot.slane %v4937_v49, %v527_v0 }
 0x208   :  { %v4626_v57 = vld [vmem:[#allocation8 + $0x1b0] sm:$0xff]   ;;  %v4630_v62 = vld [vmem:[#allocation8 + $0x1b8] sm:$0xff]   ;;  %v524_v5 = vrot.slane %v4937_v49, %v523_v1  ;;  %v532_v6 = vrot.slane %v4937_v49, %v531_v2 }
 0x209   :  { %4409 = vmatpush3.bf16.msra.mxu0 %v4585_v9  ;;  %3768 = vmatprep.mubr.bf16.mxu0 %v3210_v16 }
 0x20a   :  { %4431 = vmatpush3.bf16.msra.mxu1 %v4586_v13  ;;  %3809 = vmatprep.mubr.bf16.mxu1 %v3212_v19 }
 0x20b   :  { %4410 = vmatprep.subr.bf16.mxu0 %v4587_v17  ;;  %4432 = vmatprep.subr.bf16.mxu1 %v4588_v18 }
 0x20d   :  { %4411 = vmatpush3.bf16.msra.mxu0 %v4589_v20 }
 0x20e   :  { %4433 = vmatpush3.bf16.msra.mxu1 %v4590_v21  ;;  %4412 = vmatprep.subr.bf16.mxu0 %v4591_v58 }
 0x20f   :  { %4434 = vmatprep.subr.bf16.mxu1 %v4592_v22 }
 0x211   :  { %4413 = vmatpush3.bf16.msra.mxu0 %v4593_v23 }
 0x212   :  { %4435 = vmatpush3.bf16.msra.mxu1 %v4594_v24  ;;  %4414 = vmatprep.subr.bf16.mxu0 %v4595_v26 }
 0x213   :  { %4436 = vmatprep.subr.bf16.mxu1 %v4596_v27 }
 0x215   :  { %4415 = vmatpush3.bf16.msra.mxu0 %v4597_v28 }
 0x216   :  { %4437 = vmatpush3.bf16.msra.mxu1 %v4598_v29  ;;  %4444 = vmatprep.subr.bf16.mxu0 %v4599_v40 }
 0x217   :  { %4466 = vmatprep.subr.bf16.mxu1 %v4600_v31 }
 0x218   :  { %3769 = vmatmul.mubr.bf16.vlgmr.msra.gmra.mrb[8].mxu0 %v3209_v11 }
 0x219   :  { %3810 = vmatmul.mubr.bf16.vlgmr.msra.gmra.mrb[8].mxu1 %v3211_v14  ;;  %4445 = vmatpush3.bf16.msra.mxu0 %v4601_v32 }
 0x21a   :  { %4467 = vmatpush3.bf16.msra.mxu1 %v4602_v33  ;;  %4446 = vmatprep.subr.bf16.mxu0 %v4603_v34 }
 0x21b   :  { %4468 = vmatprep.subr.bf16.mxu1 %v4604_v35 }
 0x21d   :  { %4447 = vmatpush3.bf16.msra.mxu0 %v4605_v30  ;;  %v4335_v30 = vld [vmem:[#allocation10] ss:$0 sm:$0xff] }
 0x21e   :  { %4469 = vmatpush3.bf16.msra.mxu1 %v4606_v25  ;;  %4448 = vmatprep.subr.bf16.mxu0 %v4607_v36 }
 0x21f   :  { %4470 = vmatprep.subr.bf16.mxu1 %v4608_v54 }
 0x221   :  { %4449 = vmatpush3.bf16.msra.mxu0 %v4609_v38 }
 0x222   :  { %4471 = vmatpush3.bf16.msra.mxu1 %v4610_v39  ;;  %4450 = vmatprep.subr.bf16.mxu0 %v4611_v41 }
 0x223   :  { %4472 = vmatprep.subr.bf16.mxu1 %v4612_v42 }
 0x225   :  { %4451 = vmatpush3.bf16.msra.mxu0 %v4613_v43 }
 0x226   :  { %4473 = vmatpush3.bf16.msra.mxu1 %v4614_v44  ;;  %4452 = vmatprep.subr.bf16.mxu0 %v4615_v45 }
 0x227   :  { %4474 = vmatprep.subr.bf16.mxu1 %v4616_v37 }
 0x229   :  { %4453 = vmatpush3.bf16.msra.mxu0 %v4617_v46 }
 0x22a   :  { %4475 = vmatpush3.bf16.msra.mxu1 %v4618_v47  ;;  %4454 = vmatprep.subr.bf16.mxu0 %v4619_v48 }
 0x22b   :  { %4476 = vmatprep.subr.bf16.mxu1 %v4620_v50 }
 0x22d   :  { %4455 = vmatpush3.bf16.msra.mxu0 %v4621_v51 }
 0x22e   :  { %4477 = vmatpush3.bf16.msra.mxu1 %v4622_v52  ;;  %4456 = vmatprep.subr.bf16.mxu0 %v4623_v53 }
 0x22f   :  { %4478 = vmatprep.subr.bf16.mxu1 %v4624_v55 }
 0x231   :  { %4457 = vmatpush3.bf16.msra.mxu0 %v4625_v56 }
 0x232   :  { %4479 = vmatpush3.bf16.msra.mxu1 %v4626_v57  ;;  %4458 = vmatprep.subr.bf16.mxu0 %v4627_v59 }
 0x233   :  { %4480 = vmatprep.subr.bf16.mxu1 %v4628_v60 }
 0x235   :  { %4459 = vmatpush3.bf16.msra.mxu0 %v4629_v61 }
 0x236   :  { %4481 = vmatpush3.bf16.msra.mxu1 %v4630_v62 }
 0x2cb   :  { %v3012_v7 = vpop.f32.mrb[4].mxu0  ;;  %v3184_v9 = vpop.f32.mrb[4].mxu1 }
 0x2cc   :  { %v4496_v8 = vadd.f32 %v3012_v7, %v520_v3  ;;  %v3014_v10 = vpop.f32.mrb[5].mxu0  ;;  %v4500_v11 = vadd.f32 %v3184_v9, %v528_v4  ;;  %v3186_v13 = vpop.f32.mrb[5].mxu1 }
 0x2cd   :  { %v4497_v12 = vadd.f32 %v3014_v10, %v524_v5  ;;  %v3016_v14 = vpop.f32.mrb[6].mxu0  ;;  %v4501_v16 = vadd.f32 %v3186_v13, %v532_v6  ;;  %v3188_v18 = vpop.f32.mrb[6].mxu1 }
 0x2ce   :  { %v4498_v17 = vadd.f32 %v3016_v14, %v520_v3  ;;  %v3018_v15 = vpop.f32.mrb[7].mxu0  ;;  %v4502_v19 = vadd.f32 %v3188_v18, %v528_v4  ;;  %v3190_v21 = vpop.f32.mrb[7].mxu1  ;;  %v3197_v58 = vmax.f32 %v4496_v8, 0.0  ;;  %v3199_v24 = vmax.f32 %v4500_v11, 0.0 }
 0x2cf   :  { %v4499_v20 = vadd.f32 %v3018_v15, %v524_v5  ;;  %v4503_v23 = vadd.f32 %v3190_v21, %v532_v6  ;;  %v3198_v49 = vmax.f32 %v4497_v12, 0.0  ;;  %v3200_v28 = vmax.f32 %v4501_v16, 0.0 }
 0x2d0   :  { %v3205_v22 = vmax.f32 %v4498_v17, 0.0  ;;  %v3207_v26 = vmax.f32 %v4502_v19, 0.0 }
 0x2d1   :  { %v3206_v27 = vmax.f32 %v4499_v20, 0.0  ;;  %v3208_v40 = vmax.f32 %v4503_v23, 0.0 }
 0x2d2   :  { %v3213_v29 = vpack.c.bf16 %v3205_v22, %v3197_v58  ;;  %v3215_v31 = vpack.c.bf16 %v3207_v26, %v3199_v24 }
 0x2d3   :  { %v3214_v32 = vpack.c.bf16 %v3206_v27, %v3198_v49  ;;  %v3216_v33 = vpack.c.bf16 %v3208_v40, %v3200_v28 }
 0x2d5   :  { %3850 = vmatprep.mubr.bf16.mxu0 %v3214_v32  ;;  %3891 = vmatprep.mubr.bf16.mxu1 %v3216_v33 }
 0x2d6   :  { %3851 = vmatmul.mubr.bf16.vlgmr.msra.gmra.mrb[12].mxu0 %v3213_v29  ;;  %3892 = vmatmul.mubr.bf16.vlgmr.msra.gmra.mrb[12].mxu1 %v3215_v31 }
 0x2eb   :  { %v4416_v34 = vpop.f32.mrb[8].mxu0 }
 0x2ec   :  { %v4438_v35 = vpop.f32.mrb[8].mxu1  ;;  %v4417_v25 = vpop.f32.mrb[9].mxu0 }
 0x2ed   :  { %v4418_v36 = vadd.f32 %v4417_v25, %v4416_v34  ;;  %v4439_v54 = vpop.f32.mrb[9].mxu1  ;;  %v4419_v38 = vpop.f32.mrb[10].mxu0 }
 0x2ee   :  { %v4440_v39 = vadd.f32 %v4439_v54, %v4438_v35  ;;  %v4441_v41 = vpop.f32.mrb[10].mxu1  ;;  %v4420_v42 = vpop.f32.mrb[11].mxu0 }
 0x2ef   :  { %v3771_v43 = vadd.f32 %v4418_v36, %v4335_v30  ;;  %v4421_v44 = vadd.f32 %v4420_v42, %v4419_v38  ;;  %v4442_v45 = vpop.f32.mrb[11].mxu1 }
 0x2f0   :  { %v4443_v37 = vadd.f32 %v4442_v45, %v4441_v41 }
 0x2f1   :  { %v3812_v46 = vadd.f32 %v4440_v39, %v3771_v43  ;;  %v3774_v47 = vadd.f32 %v4421_v44, %v4335_v30 }
 0x2f3   :  { %v3815_v48 = vadd.f32 %v4443_v37, %v3774_v47 }
 0x3a9   :  { %v4460_v50 = vpop.f32.mrb[12].mxu0  ;;  %v4482_v51 = vpop.f32.mrb[12].mxu1 }
 0x3aa   :  { %v4461_v52 = vpop.f32.mrb[13].mxu0  ;;  %v4483_v55 = vpop.f32.mrb[13].mxu1 }
 0x3ab   :  { %v4462_v53 = vadd.f32 %v4461_v52, %v4460_v50  ;;  %v4463_v56 = vpop.f32.mrb[14].mxu0  ;;  %v4484_v57 = vadd.f32 %v4483_v55, %v4482_v51  ;;  %v4485_v59 = vpop.f32.mrb[14].mxu1 }
 0x3ac   :  { %v4464_v60 = vpop.f32.mrb[15].mxu0  ;;  %v4486_v63 = vpop.f32.mrb[15].mxu1 }
 0x3ad   :  { %v3853_v61 = vadd.f32 %v4462_v53, %v3812_v46  ;;  %v4465_v62 = vadd.f32 %v4464_v60, %v4463_v56  ;;  %v4487_v0 = vadd.f32 %v4486_v63, %v4485_v59 }
 0x3af   :  { %v3856_v1 = vadd.f32 %v4465_v62, %v3815_v48  ;;  %v3894_v2 = vadd.f32 %v4484_v57, %v3853_v61 }
 0x3b1   :  { %3900 = vmax.xlane.f32.xlu0 %v3894_v2  ;;  %v3897_v3 = vadd.f32 %v4487_v0, %v3856_v1 }
 0x3b5   :  { %3902 = vmax.xlane.f32.xlu0 %v3897_v3 }
 0x43e   :  { %v3901_v4 = vpop.xlane.xlu0 %3900 }
 0x43f   :  { %v3904_v5 = vsub.f32 %v3894_v2, %v3901_v4 }
 0x441   :  { %v3906_v6 = vmul.f32 1.442695, %v3904_v5 }
 0x442   :  { %v3903_v7 = vpop.xlane.xlu0 %3902 }
 0x443   :  { %4631 = vpow2.f32 %v3906_v6  ;;  %v3905_v8 = vsub.f32 %v3897_v3, %v3903_v7 }
 0x445   :  { %v3908_v9 = vmul.f32 1.442695, %v3905_v8 }
 0x447   :  { %4633 = vpow2.f32 %v3908_v9 }
 0x44d   :  { %v4632_v10 = vpop.eup %4631 }
 0x44e   :  { %3910 = vadd.xlane.f32.xlu1 %v4632_v10 }
 0x451   :  { %v4634_v11 = vpop.eup %4633 }
 0x452   :  { %3912 = vadd.xlane.f32.xlu1 %v4634_v11 }
 0x4db   :  { %v3911_v12 = vpop.xlane.xlu1 %3910 }
 0x4dc   :  { %4635 = vrcp.f32 %v3911_v12 }
 0x4df   :  { %v3913_v13 = vpop.xlane.xlu1 %3912 }
 0x4e0   :  { %4637 = vrcp.f32 %v3913_v13 }
 0x4e6   :  { %v4636_v14 = vpop.eup %4635 }
 0x4e7   :  { %v3916_v16 = vmul.f32 %v4636_v14, %v4632_v10 }
 0x4e9   :  { %3918 = vst [vmem:[#allocation11] sm:$0xff] %v3916_v16 }
 0x4ea   :  { %v4638_v17 = vpop.eup %4637 }
 0x4eb   :  { %v3917_v18 = vmul.f32 %v4638_v17, %v4634_v11 }
 0x4ed   :  { %3919 = vst [vmem:[#allocation11 + $0x8] sm:$0xff] %v3917_v18 }
 0x4ee   :  { %4760 = shalt.err (!%p4757_p2)
}
 0x4ef   :  { %s4761_s8 = scalar_lea.hbm %s4971_s5, 256 }
 0x4f0   :  { %p4762_p3 = scmp.ne.s32.totalorder %s4971_s5, %s4761_s8  ;;  %p4765_p4 = scmp.lt.u32.totalorder %s4761_s8, %s4971_s5 }
 0x4f2   :  { %p4767_p5 = pnand %p4765_p4, %p4762_p3 }
 0x4f4   :  { %4770 = shalt.err (!%p4767_p5)
}
 0x4f5   :  { %s4792_s13 = smov 128   ;;  %s4793_s14 = smov 8  }
 0x4f6   :  { %3931 = dma.vmem_to_hbm [thread:$0]  %s3926_s3, 256, %s4971_s5, [#allocation4], %s4792_s13, %s4792_s13, %s4793_s14  }
 0x4f7   :  { %4777 = dma.done.wait [#allocation4], 256  }
 0x4f8   :  { %4778 = vsyncadd [#allocation4], 4294967040 }
 0x4f9   :  { %3935 = vsyncpa [#allocation3], 1 }
 0x4fa   :  { %3936 = vsyncpa [#allocation6], 1 }
 0x4fb   :  { %3937 = vsyncpa [#allocation9], 1 }
 0x4fc   :  { %3938 = vsyncpa [#allocation4], 1 }

</bundles_post_ra>
